<compile_context>
chip_gen: v7x
topology: tpu7x:2x2x1
jax: 0.10.0
libtpu: 0.0.40
codegen_flags: <defaults>
</compile_context>

<pallas_src>
import functools

import jax
import jax.numpy as jnp
from jax.experimental import pallas as pl
from jax.experimental.pallas import tpu as pltpu


# ---------------------------------------------------------------------------
# Fully fused circuit forward kernel (one batch tile per grid step).
# ---------------------------------------------------------------------------
def _fused_circuit_kernel(x_ref, w_in_ref, *rest):
    """Whole circuit forward for one batch tile; activations never leave VMEM/vregs.

    x_ref    : (bt, D*C)            inputs, lane-dense (variable x channel folded)
    w_in_ref : (D*C, D*K)           input-layer block matrix (natural params per var)
    rest     : (W_1, ..., W_L, out_ref)
      W_l    : (N_l*K_in, N_l*K_out) permuted-block-diagonal exp(log-weights)
      out    : (bt, class_pad)       root log-scores, class dim padded to 128 lanes
    """
    w_refs, out_ref = rest[:-1], rest[-1]

    # Input layer: one lane-dense MXU matmul replaces D tiny per-variable C=4
    # contractions (kept f32: C is tiny and it feeds the log-space recursion).
    h = jnp.dot(x_ref[...], w_in_ref[...],
                preferred_element_type=jnp.float32)          # (bt, D*K), log-space

    # Fused CP (sum-product) levels.  The wrapper orders each level's output
    # lane-blocks [left children..., right children...] of the next level, so
    # child pairing is a contiguous half-split add (no reshape, no transpose).
    for w_ref in w_refs:
        half = h.shape[1] // 2
        p = h[:, :half] + h[:, half:]                        # (bt, N*K_in) log-Hadamard
        # Row-wise stabilizer; exact since out = m + log(sum exp(p - m) * w) and the
        # weights are softmax-normalized (exp(p - m) * w <= 1 => no overflow).
        # NOTE: an all -inf row (fully masked input) would still produce NaN here,
        # whereas jax.nn.logsumexp returns -inf; out of scope for this circuit.
        m = jnp.max(p, axis=-1, keepdims=True)               # (bt, 1)
        e = jnp.exp(p - m)                                   # (bt, N*K_in) in (0, 1]
        # One block-diagonal matmul covers every node of the level in a single
        # MXU pass; operands optionally bf16 (w_ref dtype), f32 accumulation.
        s = jnp.dot(e.astype(w_ref.dtype), w_ref[...],
                    preferred_element_type=jnp.float32)      # (bt, N*K_out)
        h = m + jnp.log(s)                                   # logsumexp(logw + p)

    out_ref[...] = h.astype(out_ref.dtype)                   # (bt, class_pad)


# ---------------------------------------------------------------------------
# One-time parameter preprocessing (per parameter update, NOT per forward).
# ---------------------------------------------------------------------------
def prepare_params(params, *, level_dtype=jnp.float32, class_pad=128):
    """Build lane-dense block weight matrices for the fused kernel.

    Returns (w_in, level_ws, num_classes):
      w_in      : (D*C, D*K) f32    input-layer block matrix
      level_ws  : tuple of (N*K_in, N*K_out) per CP level (root classes padded)
      num_classes : int
    """
    eta = params["eta"]                         # (D, C, K)
    logws = params["cp_logw"]                   # [(N_l, K_out, K_in), ...] root last
    D, C, K = eta.shape

    def perm(n):
        # Output lane-block order: left children of the next level first, then right.
        order = jnp.array(list(range(0, n, 2)) + list(range(1, n, 2)), jnp.int32)
        return jnp.zeros((n, n), jnp.float32).at[order, jnp.arange(n)].set(1.0)

    # Input layer block matrix: block (d, q) = eta[d] iff variable d sits at position q.
    w_in = jnp.einsum("dck,dq->dcqk", eta, perm(D)).reshape(D * C, D * K)

    level_ws = []
    for li, logw in enumerate(logws):
        n, k_out, k_in = logw.shape
        # exp once here; very negative log-weights underflow to 0 in f32, which is
        # exact for softmax-normalized weights (they are simply negligible terms).
        w_nodes = jnp.exp(jnp.swapaxes(logw, -1, -2))        # (n, k_in, k_out) > 0
        if li + 1 < len(logws):
            W = jnp.einsum("nio,nq->niqo", w_nodes, perm(n)).reshape(n * k_in,
                                                                     n * k_out)
        else:
            # Root (single output node): pad the class dim to a full 128-lane tile so
            # the final store is unmasked; padded columns get weight 1.0 (finite logs)
            # and are sliced off in the wrapper.
            assert n == 1 and k_out <= class_pad, (n, k_out, class_pad)
            W = jnp.concatenate(
                [w_nodes[0], jnp.ones((k_in, class_pad - k_out), jnp.float32)],
                axis=1)
        level_ws.append(W.astype(level_dtype))

    return w_in, tuple(level_ws), logws[-1].shape[1]


# ---------------------------------------------------------------------------
# Forward wrapper: single fused pallas_call over batch tiles.
# ---------------------------------------------------------------------------
@functools.partial(jax.jit, static_argnames=("num_classes", "block_batch"))
def circuit_forward(x, w_in, level_ws, *, num_classes, block_batch=128):
    """x: (B, D, C) f32 -> (B, num_out=1, num_classes) f32."""
    B = x.shape[0]
    dc = w_in.shape[0]
    x2 = x.reshape(B, dc)             # contiguous fold: a bitcast, no extra HBM pass

    bt = min(block_batch, B)
    # TODO(synk): partial-tile masking for batch sizes not divisible by the tile.
    assert B % bt == 0 and bt % 8 == 0, (B, bt)
    ncls_pad = level_ws[-1].shape[1]

    in_specs = [pl.BlockSpec((bt, dc), lambda b: (b, 0)),
                pl.BlockSpec(w_in.shape, lambda b: (0, 0))]
    # Weight blocks are batch-invariant and stay resident across grid steps.  When
    # they get large (big K/N on v7x's 64 MiB VMEM) add pipeline_mode=pl.Buffered(1)
    # and/or level_dtype=bfloat16 in prepare_params.
    in_specs += [pl.BlockSpec(w.shape, lambda b: (0, 0)) for w in level_ws]

    out = pl.pallas_call(
        _fused_circuit_kernel,
        out_shape=jax.ShapeDtypeStruct((B, ncls_pad), jnp.float32),
        grid=(B // bt,),
        in_specs=in_specs,
        out_specs=pl.BlockSpec((bt, ncls_pad), lambda b: (b, 0)),
        compiler_params=pltpu.CompilerParams(
            dimension_semantics=("parallel",),       # megacore / v7x dual-TC sharding
            vmem_limit_bytes=32 * 1024 * 1024,       # explicit (v5e default is 16 MiB)
        ),
    )(x2, w_in, *level_ws)

    return out[:, :num_classes][:, None, :]          # (B, 1, num_classes)


# ---------------------------------------------------------------------------
# Pure-JAX reference with identical semantics (natural node order, logsumexp).
# ---------------------------------------------------------------------------
def circuit_forward_ref(params, x):
    h = jnp.einsum("bdc,dck->dbk", x, params["eta"])
    for logw in params["cp_logw"]:
        N = h.shape[0] // 2
        ch = h.reshape(N, 2, *h.shape[1:])
        p = ch[:, 0] + ch[:, 1]                                  # (N, B, K_in)
        h = jax.nn.logsumexp(logw[:, None, :, :] + p[:, :, None, :], axis=-1)
    return jnp.transpose(h, (1, 0, 2))                           # (B, 1, num_classes)


if __name__ == "__main__":
    # Small concrete circuit: D=8 vars, C=4 channels, K=32 units, 8 classes, 1 output.
    # B=256 with a 128-row batch tile -> 2 "parallel" grid steps (dual-TC / pipelining).
    B, D, C, K, NCLS = 256, 8, 4, 32, 8

    key = jax.random.PRNGKey(0)
    kx, ke, kw1, kw2, kw3 = jax.random.split(key, 5)

    x = jax.random.normal(kx, (B, D, C), dtype=jnp.float32)
    eta = 0.1 * jax.random.normal(ke, (D, C, K), dtype=jnp.float32)
    level_shapes = [(D // 2, K, K), (D // 4, K, K), (D // 8, NCLS, K)]   # 8 -> 4 -> 2 -> 1
    cp_logw = [
        jax.nn.log_softmax(jax.random.normal(kw, s, dtype=jnp.float32), axis=-1)
        for kw, s in zip((kw1, kw2, kw3), level_shapes)
    ]
    params = {"eta": eta, "cp_logw": cp_logw}

    ref = circuit_forward_ref(params, x)

    # f32 MXU path: strict check against the pure-JAX reference.
    w_in, ws, ncls = prepare_params(params)                     # once per param update
    out = jax.block_until_ready(circuit_forward(x, w_in, ws, num_classes=ncls))
    assert out.shape == (B, 1, NCLS), out.shape
    assert jnp.allclose(out, ref, atol=1e-4, rtol=1e-4), \
        float(jnp.max(jnp.abs(out - ref)))

    # bf16 MXU-operand path (review item): ~2x MXU throughput, half the resident
    # weight VMEM (v7x knob).  bf16 rounding in log-space costs ~1e-3..1e-2 absolute,
    # so it is verified at a looser tolerance.
    w_in_h, ws_h, _ = prepare_params(params, level_dtype=jnp.bfloat16)
    out_h = jax.block_until_ready(circuit_forward(x, w_in_h, ws_h, num_classes=ncls))
    assert out_h.shape == (B, 1, NCLS), out_h.shape
    assert jnp.allclose(out_h, ref, atol=5e-2, rtol=5e-2), \
        float(jnp.max(jnp.abs(out_h - ref)))

    print("KERNEL_OK")
</pallas_src>

<mosaic_0001>
module attributes {stable_mosaic.version = 11 : i64} {
  func.func @_fused_circuit_kernel(%arg0: i32, %arg1: memref<128x32xf32, #tpu.memory_space<vmem>>, %arg2: memref<32x256xf32, #tpu.memory_space<vmem>>, %arg3: memref<128x128xf32, #tpu.memory_space<vmem>>, %arg4: memref<64x64xf32, #tpu.memory_space<vmem>>, %arg5: memref<32x128xf32, #tpu.memory_space<vmem>>, %arg6: memref<128x128xf32, #tpu.memory_space<vmem>>) attributes {dimension_semantics = [#tpu.dimension_semantics<parallel>], iteration_bounds = array<i64: 2>, scalar_prefetch = 0 : i64, scratch_operands = 0 : i64, tpu.core_type = #tpu.core_type<tc>, window_params = [{transform_indices = @transform_0, window_bounds = array<i64: 128, 32>}, {pipeline_mode = #tpu.pipeline_mode<synchronous>, transform_indices = @transform_1, window_bounds = array<i64: 32, 256>}, {pipeline_mode = #tpu.pipeline_mode<synchronous>, transform_indices = @transform_2, window_bounds = array<i64: 128, 128>}, {pipeline_mode = #tpu.pipeline_mode<synchronous>, transform_indices = @transform_3, window_bounds = array<i64: 64, 64>}, {pipeline_mode = #tpu.pipeline_mode<synchronous>, transform_indices = @transform_4, window_bounds = array<i64: 32, 128>}, {transform_indices = @transform_5, window_bounds = array<i64: 128, 128>}]} {
    %c0 = arith.constant 0 : index
    %c0_0 = arith.constant 0 : index
    %0 = vector.load %arg1[%c0, %c0_0] : memref<128x32xf32, #tpu.memory_space<vmem>>, vector<128x32xf32>
    %c0_1 = arith.constant 0 : index
    %c0_2 = arith.constant 0 : index
    %1 = vector.load %arg2[%c0_1, %c0_2] : memref<32x256xf32, #tpu.memory_space<vmem>>, vector<32x256xf32>
    %cst = arith.constant dense<0.000000e+00> : vector<128x256xf32>
    %2 = tpu.matmul %0, %1, %cst {dimension_numbers = #tpu.dot_dimension_numbers<[1], [0], [0], [1], [0, 0, 1, 1], [], []>} : vector<128x32xf32>, vector<32x256xf32>, vector<128x256xf32> -> vector<128x256xf32>
    %3 = vector.extract_strided_slice %2 {offsets = [0, 0], sizes = [128, 128], strides = [1, 1]} : vector<128x256xf32> to vector<128x128xf32>
    %4 = vector.extract_strided_slice %2 {offsets = [0, 128], sizes = [128, 128], strides = [1, 1]} : vector<128x256xf32> to vector<128x128xf32>
    %5 = arith.addf %3, %4 : vector<128x128xf32>
    %cst_3 = arith.constant dense<0xFF800000> : vector<128xf32>
    %6 = vector.multi_reduction <maximumf>, %5, %cst_3 [1] : vector<128x128xf32> to vector<128xf32>
    %7 = vector.shape_cast %6 : vector<128xf32> to vector<128x1xf32>
    %8 = vector.broadcast %7 : vector<128x1xf32> to vector<128x128xf32>
    %9 = arith.subf %5, %8 : vector<128x128xf32>
    %10 = math.exp %9 : vector<128x128xf32>
    %c0_4 = arith.constant 0 : index
    %c0_5 = arith.constant 0 : index
    %11 = vector.load %arg3[%c0_4, %c0_5] : memref<128x128xf32, #tpu.memory_space<vmem>>, vector<128x128xf32>
    %cst_6 = arith.constant dense<0.000000e+00> : vector<128x128xf32>
    %12 = tpu.matmul %10, %11, %cst_6 {dimension_numbers = #tpu.dot_dimension_numbers<[1], [0], [0], [1], [0, 0, 1, 1], [], []>} : vector<128x128xf32>, vector<128x128xf32>, vector<128x128xf32> -> vector<128x128xf32>
    %13 = math.log %12 : vector<128x128xf32>
    %14 = vector.broadcast %7 : vector<128x1xf32> to vector<128x128xf32>
    %15 = arith.addf %14, %13 : vector<128x128xf32>
    %16 = vector.extract_strided_slice %15 {offsets = [0, 0], sizes = [128, 64], strides = [1, 1]} : vector<128x128xf32> to vector<128x64xf32>
    %17 = vector.extract_strided_slice %15 {offsets = [0, 64], sizes = [128, 64], strides = [1, 1]} : vector<128x128xf32> to vector<128x64xf32>
    %18 = arith.addf %16, %17 : vector<128x64xf32>
    %cst_7 = arith.constant dense<0xFF800000> : vector<128xf32>
    %19 = vector.multi_reduction <maximumf>, %18, %cst_7 [1] : vector<128x64xf32> to vector<128xf32>
    %20 = vector.shape_cast %19 : vector<128xf32> to vector<128x1xf32>
    %21 = vector.broadcast %20 : vector<128x1xf32> to vector<128x64xf32>
    %22 = arith.subf %18, %21 : vector<128x64xf32>
    %23 = math.exp %22 : vector<128x64xf32>
    %c0_8 = arith.constant 0 : index
    %c0_9 = arith.constant 0 : index
    %24 = vector.load %arg4[%c0_8, %c0_9] : memref<64x64xf32, #tpu.memory_space<vmem>>, vector<64x64xf32>
    %cst_10 = arith.constant dense<0.000000e+00> : vector<128x64xf32>
    %25 = tpu.matmul %23, %24, %cst_10 {dimension_numbers = #tpu.dot_dimension_numbers<[1], [0], [0], [1], [0, 0, 1, 1], [], []>} : vector<128x64xf32>, vector<64x64xf32>, vector<128x64xf32> -> vector<128x64xf32>
    %26 = math.log %25 : vector<128x64xf32>
    %27 = vector.broadcast %20 : vector<128x1xf32> to vector<128x64xf32>
    %28 = arith.addf %27, %26 : vector<128x64xf32>
    %29 = vector.extract_strided_slice %28 {offsets = [0, 0], sizes = [128, 32], strides = [1, 1]} : vector<128x64xf32> to vector<128x32xf32>
    %30 = vector.extract_strided_slice %28 {offsets = [0, 32], sizes = [128, 32], strides = [1, 1]} : vector<128x64xf32> to vector<128x32xf32>
    %31 = arith.addf %29, %30 : vector<128x32xf32>
    %cst_11 = arith.constant dense<0xFF800000> : vector<128xf32>
    %32 = vector.multi_reduction <maximumf>, %31, %cst_11 [1] : vector<128x32xf32> to vector<128xf32>
    %33 = vector.shape_cast %32 : vector<128xf32> to vector<128x1xf32>
    %34 = vector.broadcast %33 : vector<128x1xf32> to vector<128x32xf32>
    %35 = arith.subf %31, %34 : vector<128x32xf32>
    %36 = math.exp %35 : vector<128x32xf32>
    %c0_12 = arith.constant 0 : index
    %c0_13 = arith.constant 0 : index
    %37 = vector.load %arg5[%c0_12, %c0_13] : memref<32x128xf32, #tpu.memory_space<vmem>>, vector<32x128xf32>
    %cst_14 = arith.constant dense<0.000000e+00> : vector<128x128xf32>
    %38 = tpu.matmul %36, %37, %cst_14 {dimension_numbers = #tpu.dot_dimension_numbers<[1], [0], [0], [1], [0, 0, 1, 1], [], []>} : vector<128x32xf32>, vector<32x128xf32>, vector<128x128xf32> -> vector<128x128xf32>
    %39 = math.log %38 : vector<128x128xf32>
    %40 = vector.broadcast %33 : vector<128x1xf32> to vector<128x128xf32>
    %41 = arith.addf %40, %39 : vector<128x128xf32>
    %c0_15 = arith.constant 0 : index
    %c0_16 = arith.constant 0 : index
    %42 = vector.load %arg6[%c0_15, %c0_16] : memref<128x128xf32, #tpu.memory_space<vmem>>, vector<128x128xf32>
    tpu.vector_store %arg6[%c0_15, %c0_16], %41 {strides = array<i32>} : memref<128x128xf32, #tpu.memory_space<vmem>>, vector<128x128xf32>,
    return
  }
  func.func @transform_0(%arg0: i32) -> (i32, i32) {
    %c0_i32 = arith.constant 0 : i32
    %c0_i32_0 = arith.constant 0 : i32
    return %arg0, %c0_i32 : i32, i32
  }
  func.func @transform_1(%arg0: i32) -> (i32, i32) {
    %c0_i32 = arith.constant 0 : i32
    %c0_i32_0 = arith.constant 0 : i32
    %c0_i32_1 = arith.constant 0 : i32
    return %c0_i32, %c0_i32_0 : i32, i32
  }
  func.func @transform_2(%arg0: i32) -> (i32, i32) {
    %c0_i32 = arith.constant 0 : i32
    %c0_i32_0 = arith.constant 0 : i32
    %c0_i32_1 = arith.constant 0 : i32
    return %c0_i32, %c0_i32_0 : i32, i32
  }
  func.func @transform_3(%arg0: i32) -> (i32, i32) {
    %c0_i32 = arith.constant 0 : i32
    %c0_i32_0 = arith.constant 0 : i32
    %c0_i32_1 = arith.constant 0 : i32
    return %c0_i32, %c0_i32_0 : i32, i32
  }
  func.func @transform_4(%arg0: i32) -> (i32, i32) {
    %c0_i32 = arith.constant 0 : i32
    %c0_i32_0 = arith.constant 0 : i32
    %c0_i32_1 = arith.constant 0 : i32
    return %c0_i32, %c0_i32_0 : i32, i32
  }
  func.func @transform_5(%arg0: i32) -> (i32, i32) {
    %c0_i32 = arith.constant 0 : i32
    %c0_i32_0 = arith.constant 0 : i32
    return %arg0, %c0_i32 : i32, i32
  }
}

</mosaic_0001>

<bundles_post_ra>
// kernel: circuit_forward.1
= control target key start
LH: loop header
LB: loop body
LE: loop exit
PB: predicated region body
PF: predicated region fallthrough
CT: control target
= control target key end

     0   :  { %s2261_s18 = smov 0   ;;  %s3053_s0 = inlined_call_operand.vmem [shape: f32[256,32], index: 0, kind: input, shape index: {}]   ;;  %s3054_s1 = inlined_call_operand.vmem [shape: f32[32,256], index: 1, kind: input, shape index: {}]   ;;  %s3055_s2 = inlined_call_operand.vmem [shape: f32[128,128], index: 2, kind: input, shape index: {}]   ;;  %s3056_s3 = inlined_call_operand.vmem [shape: f32[64,64], index: 3, kind: input, shape index: {}]   ;;  %s3057_s4 = inlined_call_operand.vmem [shape: f32[32,128], index: 4, kind: input, shape index: {}]   ;;  %s3058_s5 = inlined_call_operand.vmem [shape: f32[256,128], index: 5, kind: output, shape index: {}]  }
   0x1 LB: > { %s1686_s19 = sadd.s32 4294967295, %s2226_s18   ;;  %p1690_p0 = scmp.ge.s32.totalorder %s2226_s18, 1  ;;  %s2226_s18 = sphi %s2261_s18, %s15_s18  }
   0x2   : > { %p188_p1 = scmp.lt.s32.totalorder %s2226_s18, 3 }
   0x4   : > { %p189_p2 = pnand %p1690_p0, %p188_p1 }
   0x5   : > { %v245_v0 = vld [vmem:[%s3054_s1 + $0x8] sm:$0xff] (!%p189_p2)  ;;  %v247_v1 = vld [vmem:[%s3054_s1 + $0x18] sm:$0xff] (!%p189_p2)  ;;  %v244_v2 = vld [vmem:[%s3054_s1] sm:$0xff] (!%p189_p2)  ;;  %s1691_s26 = sshll.u32 (!%p189_p2), %s1686_s19, 4  ;;  %v2228_v7 = vmov (!%p189_p2), 0.0   ;;  %vm252_vm0 = vcmask (!%p189_p2), 261120  }
   0x6   : > { %192 = sbr.rel (%p189_p2) target bundleno = 1689 (0x699), region = 40  ;;  %v1949_v3 = vpack.c.bf16 (!%p189_p2), %v247_v1, %v245_v0  ;;  %v246_v4 = vld [vmem:[%s3054_s1 + $0x10] sm:$0xff] (!%p189_p2)  ;;  %v249_v5 = vld [vmem:[%s3054_s1 + $0x28] sm:$0xff] (!%p189_p2)  ;;  %v251_v6 = vld [vmem:[%s3054_s1 + $0x38] sm:$0xff] (!%p189_p2)  ;;  %365 = vmatprep.mubr.f32.mxu0 (!%p189_p2), %v2228_v7  ;;  %p217_p3 = scmp.lt.s32.totalorder (!%p189_p2), %s1691_s26, 31  ;;  %vm847_vm1 = vcmask (!%p189_p2), 523264  }
   0x7   : > { %v1951_v8 = vpack.c.bf16 (!%p189_p2), %v246_v4, %v244_v2  ;;  %v1953_v9 = vpack.c.bf16 (!%p189_p2), %v251_v6, %v249_v5  ;;  %v248_v10 = vld [vmem:[%s3054_s1 + $0x20] sm:$0xff] (!%p189_p2)  ;;  %v250_v11 = vld [vmem:[%s3054_s1 + $0x30] sm:$0xff] (!%p189_p2)  ;;  %v559_v30 = vld [vmem:[%s3055_s2 + $0x8] sm:$0xff] (!%p189_p2)  ;;  %s2229_s28 = smov (!%p189_p2), 64   ;;  %s2230_s22 = smov (!%p189_p2), 96  }
   0x8   : > { %1950 = vmatprep.subr.bf16.mxu0 (!%p189_p2), %v1949_v3  ;;  %v1955_v12 = vpack.c.bf16 (!%p189_p2), %v250_v11, %v248_v10  ;;  %v558_v29 = vld [vmem:[%s3055_s2] sm:$0xff] (!%p189_p2)  ;;  %v560_v31 = vld [vmem:[%s3055_s2 + $0x10] sm:$0xff] (!%p189_p2)  ;;  %v561_v33 = vld [vmem:[%s3055_s2 + $0x18] sm:$0xff] (!%p189_p2) }
   0x9   : > { %1952 = vmatpush1.bf16.msra.mxu0 (!%p189_p2), %v1951_v8  ;;  %v1957_v32 = vpack.c.bf16 (!%p189_p2), %v559_v30, %v558_v29  ;;  %v1961_v34 = vpack.c.bf16 (!%p189_p2), %v561_v33, %v560_v31  ;;  %v562_v35 = vld [vmem:[%s3055_s2 + $0x20] sm:$0xff] (!%p189_p2)  ;;  %v563_v36 = vld [vmem:[%s3055_s2 + $0x28] sm:$0xff] (!%p189_p2)  ;;  %v564_v38 = vld [vmem:[%s3055_s2 + $0x30] sm:$0xff] (!%p189_p2) }
   0xa   : > { %1954 = vmatprep.subr.bf16.mxu0 (!%p189_p2), %v1953_v9  ;;  %v1965_v37 = vpack.c.bf16 (!%p189_p2), %v563_v36, %v562_v35  ;;  %v565_v39 = vld [vmem:[%s3055_s2 + $0x38] sm:$0xff] (!%p189_p2)  ;;  %v566_v56 = vld [vmem:[%s3055_s2 + $0x40] sm:$0xff] (!%p189_p2)  ;;  %v567_v57 = vld [vmem:[%s3055_s2 + $0x48] sm:$0xff] (!%p189_p2) }
   0xb   : > { %1958 = vmatprep.subr.bf16.mxu1 (!%p189_p2), %v1957_v32  ;;  %v1969_v40 = vpack.c.bf16 (!%p189_p2), %v565_v39, %v564_v38  ;;  %v1973_v58 = vpack.c.bf16 (!%p189_p2), %v567_v57, %v566_v56  ;;  %v568_v62 = vld [vmem:[%s3055_s2 + $0x50] sm:$0xff] (!%p189_p2)  ;;  %v569_v63 = vld [vmem:[%s3055_s2 + $0x58] sm:$0xff] (!%p189_p2)  ;;  %v570_v4 = vld [vmem:[%s3055_s2 + $0x60] sm:$0xff] (!%p189_p2) }
   0xc   : > { %1960 = vmatpush3.bf16.msra.mxu1 (!%p189_p2), %v1957_v32  ;;  %v1977_v0 = vpack.c.bf16 (!%p189_p2), %v569_v63, %v568_v62  ;;  %v571_v5 = vld [vmem:[%s3055_s2 + $0x68] sm:$0xff] (!%p189_p2)  ;;  %v572_v10 = vld [vmem:[%s3055_s2 + $0x70] sm:$0xff] (!%p189_p2)  ;;  %v573_v11 = vld [vmem:[%s3055_s2 + $0x78] sm:$0xff] (!%p189_p2) }
   0xd   : > { %s3060_s26 = smov (!%p217_p3, %s1691_s26), 31  ;;  %1956 = vmatpush1.bf16.msra.mxu0 %v1955_v12  ;;  %1962 = vmatprep.subr.bf16.mxu1 %v1961_v34  ;;  %v1981_v6 = vpack.c.bf16 %v571_v5, %v570_v4  ;;  %v1985_v12 = vpack.c.bf16 %v573_v11, %v572_v10 }
   0xe   : > { %s1692_s12 = sshll.u32 %s3060_s26, 3 }
   0xf   : > { %s2301_s15 = scalar_lea.vmem %s3053_s0, %s1692_s12  ;;  %s3016_s9 = scalar_lea.vmem %s3058_s5, %s1692_s12 }
  0x10   : > { %v228_v13 = vld [vmem:[%s2301_s15] sm:$0xff]  ;;  %v229_v14 = vld [vmem:[%s2301_s15 + $0x8] sm:$0xff]  ;;  %v230_v15 = vld [vmem:[%s2301_s15 + $0x10] sm:$0xff]  ;;  %1964 = vmatpush3.bf16.msra.mxu1 %v1961_v34 }
  0x11   : > { %1695 = vmatmul.mubr.msk.f32.vlgmr.msra.gmra.mrb[0].mxu0 %vm252_vm0, %v228_v13  ;;  %v231_v16 = vld [vmem:[%s2301_s15 + $0x18] sm:$0xff]  ;;  %v232_v17 = vld [vmem:[%s2301_s15 + $0x20] sm:$0xff]  ;;  %v233_v18 = vld [vmem:[%s2301_s15 + $0x28] sm:$0xff]  ;;  %1966 = vmatprep.subr.bf16.mxu1 %v1965_v37 }
  0x12   : > { %371 = vmatprep.mubr.f32.mxu0 %v2228_v7  ;;  %v234_v19 = vld [vmem:[%s2301_s15 + $0x30] sm:$0xff]  ;;  %v235_v20 = vld [vmem:[%s2301_s15 + $0x38] sm:$0xff]  ;;  %v236_v21 = vld [vmem:[%s2301_s15 + $0x40] sm:$0xff] }
  0x13   : > { %v237_v22 = vld [vmem:[%s2301_s15 + $0x48] sm:$0xff]  ;;  %v238_v23 = vld [vmem:[%s2301_s15 + $0x50] sm:$0xff]  ;;  %v239_v24 = vld [vmem:[%s2301_s15 + $0x58] sm:$0xff] }
  0x14   : > { %v240_v25 = vld [vmem:[%s2301_s15 + $0x60] sm:$0xff]  ;;  %v241_v26 = vld [vmem:[%s2301_s15 + $0x68] sm:$0xff]  ;;  %v242_v27 = vld [vmem:[%s2301_s15 + $0x70] sm:$0xff]  ;;  %1968 = vmatpush3.bf16.msra.mxu1 %v1965_v37 }
  0x15   : > { %1696 = vmatmul.mubr.msk.f32.gmra.mrb[2].mxu0 %vm252_vm0, %v229_v14  ;;  %v243_v28 = vld [vmem:[%s2301_s15 + $0x78] sm:$0xff]  ;;  %1970 = vmatprep.subr.bf16.mxu1 %v1969_v40 }
  0x16   : > { %377 = vmatprep.mubr.f32.mxu0 %v2228_v7 }
  0x18   : > { %1972 = vmatpush3.bf16.msra.mxu1 %v1969_v40 }
  0x19   : > { %1697 = vmatmul.mubr.msk.f32.gmra.mrb[4].mxu0 %vm252_vm0, %v230_v15  ;;  %1974 = vmatprep.subr.bf16.mxu1 %v1973_v58 }
  0x1a   : > { %383 = vmatprep.mubr.f32.mxu0 %v2228_v7 }
  0x1c   : > { %1976 = vmatpush3.bf16.msra.mxu1 %v1973_v58 }
  0x1d   : > { %1698 = vmatmul.mubr.msk.f32.gmra.mrb[6].mxu0 %vm252_vm0, %v231_v16  ;;  %1978 = vmatprep.subr.bf16.mxu1 %v1977_v0 }
  0x1e   : > { %389 = vmatprep.mubr.f32.mxu0 %v2228_v7 }
  0x20   : > { %1980 = vmatpush3.bf16.msra.mxu1 %v1977_v0 }
  0x21   : > { %1699 = vmatmul.mubr.msk.f32.gmra.mrb[8].mxu0 %vm252_vm0, %v232_v17  ;;  %1982 = vmatprep.subr.bf16.mxu1 %v1981_v6 }
  0x22   : > { %395 = vmatprep.mubr.f32.mxu0 %v2228_v7 }
  0x24   : > { %1984 = vmatpush3.bf16.msra.mxu1 %v1981_v6 }
  0x25   : > { %1700 = vmatmul.mubr.msk.f32.gmra.mrb[10].mxu0 %vm252_vm0, %v233_v18  ;;  %1986 = vmatprep.subr.bf16.mxu1 %v1985_v12 }
  0x26   : > { %401 = vmatprep.mubr.f32.mxu0 %v2228_v7 }
  0x28   : > { %1988 = vmatpush3.bf16.msra.mxu1 %v1985_v12 }
  0x29   : > { %1701 = vmatmul.mubr.msk.f32.gmra.mrb[12].mxu0 %vm252_vm0, %v234_v19 }
  0x2a   : > { %407 = vmatprep.mubr.f32.mxu0 %v2228_v7 }
  0x2d   : > { %1702 = vmatmul.mubr.msk.f32.gmra.mrb[14].mxu0 %vm252_vm0, %v235_v20 }
  0x2e   : > { %413 = vmatprep.mubr.f32.mxu0 %v2228_v7 }
  0x31   : > { %1703 = vmatmul.mubr.msk.f32.gmra.mrb[16].mxu0 %vm252_vm0, %v236_v21 }
  0x32   : > { %419 = vmatprep.mubr.f32.mxu0 %v2228_v7 }
  0x35   : > { %1704 = vmatmul.mubr.msk.f32.gmra.mrb[18].mxu0 %vm252_vm0, %v237_v22 }
  0x36   : > { %425 = vmatprep.mubr.f32.mxu0 %v2228_v7 }
  0x39   : > { %1705 = vmatmul.mubr.msk.f32.gmra.mrb[20].mxu0 %vm252_vm0, %v238_v23 }
  0x3a   : > { %431 = vmatprep.mubr.f32.mxu0 %v2228_v7 }
  0x3d   : > { %1706 = vmatmul.mubr.msk.f32.gmra.mrb[22].mxu0 %vm252_vm0, %v239_v24 }
  0x3e   : > { %437 = vmatprep.mubr.f32.mxu0 %v2228_v7 }
  0x41   : > { %1707 = vmatmul.mubr.msk.f32.gmra.mrb[24].mxu0 %vm252_vm0, %v240_v25 }
  0x42   : > { %443 = vmatprep.mubr.f32.mxu0 %v2228_v7 }
  0x45   : > { %1708 = vmatmul.mubr.msk.f32.gmra.mrb[26].mxu0 %vm252_vm0, %v241_v26 }
  0x46   : > { %449 = vmatprep.mubr.f32.mxu0 %v2228_v7 }
  0x49   : > { %1709 = vmatmul.mubr.msk.f32.gmra.mrb[28].mxu0 %vm252_vm0, %v242_v27 }
  0x4a   : > { %455 = vmatprep.mubr.f32.mxu0 %v2228_v7 }
  0x4d   : > { %1710 = vmatmul.mubr.msk.f32.gmra.mrb[30].mxu0 %vm252_vm0, %v243_v28 }
  0xe4   : > { %v367_v41 = vpop.f32.mrb[0].mxu0 }
  0xe5   : > { %v369_v42 = vpop.f32.mrb[1].mxu0 }
  0xe6   : > { %v2359_v43 = vadd.f32 %v369_v42, %v367_v41 }
  0xe8   : > { %478 = vmax.xlane.f32.xlu0 %v2359_v43  ;;  %v373_v44 = vpop.f32.mrb[2].mxu0 }
  0xe9   : > { %v375_v45 = vpop.f32.mrb[3].mxu0 }
  0xea   : > { %v2362_v46 = vadd.f32 %v375_v45, %v373_v44 }
  0xec   : > { %480 = vmax.xlane.f32.xlu0 %v2362_v46  ;;  %v379_v47 = vpop.f32.mrb[4].mxu0 }
  0xed   : > { %v381_v48 = vpop.f32.mrb[5].mxu0 }
  0xee   : > { %v2365_v49 = vadd.f32 %v381_v48, %v379_v47 }
  0xf0   : > { %482 = vmax.xlane.f32.xlu1 %v2365_v49  ;;  %v385_v50 = vpop.f32.mrb[6].mxu0 }
  0xf1   : > { %v387_v51 = vpop.f32.mrb[7].mxu0 }
  0xf2   : > { %v2368_v52 = vadd.f32 %v387_v51, %v385_v50 }
  0xf4   : > { %484 = vmax.xlane.f32.xlu1 %v2368_v52  ;;  %v391_v53 = vpop.f32.mrb[8].mxu0 }
  0xf5   : > { %v393_v54 = vpop.f32.mrb[9].mxu0 }
  0xf6   : > { %v2371_v55 = vadd.f32 %v393_v54, %v391_v53 }
  0xf8   : > { %486 = vmax.xlane.f32.xlu0 %v2371_v55  ;;  %v397_v59 = vpop.f32.mrb[10].mxu0 }
  0xf9   : > { %v399_v60 = vpop.f32.mrb[11].mxu0 }
  0xfa   : > { %v2380_v61 = vadd.f32 %v399_v60, %v397_v59 }
  0xfc   : > { %488 = vmax.xlane.f32.xlu1 %v2380_v61  ;;  %v403_v1 = vpop.f32.mrb[12].mxu0 }
  0xfd   : > { %v405_v2 = vpop.f32.mrb[13].mxu0 }
  0xfe   : > { %v2389_v3 = vadd.f32 %v405_v2, %v403_v1 }
 0x100   : > { %490 = vmax.xlane.f32.xlu0 %v2389_v3  ;;  %v409_v7 = vpop.f32.mrb[14].mxu0 }
 0x101   : > { %v411_v8 = vpop.f32.mrb[15].mxu0 }
 0x102   : > { %v2398_v9 = vadd.f32 %v411_v8, %v409_v7 }
 0x104   : > { %492 = vmax.xlane.f32.xlu1 %v2398_v9  ;;  %v415_v13 = vpop.f32.mrb[16].mxu0 }
 0x105   : > { %v417_v14 = vpop.f32.mrb[17].mxu0 }
 0x106   : > { %v2407_v15 = vadd.f32 %v417_v14, %v415_v13 }
 0x108   : > { %494 = vmax.xlane.f32.xlu0 %v2407_v15  ;;  %v421_v16 = vpop.f32.mrb[18].mxu0 }
 0x109   : > { %v423_v17 = vpop.f32.mrb[19].mxu0 }
 0x10a   : > { %v2410_v18 = vadd.f32 %v423_v17, %v421_v16 }
 0x10c   : > { %496 = vmax.xlane.f32.xlu1 %v2410_v18  ;;  %v427_v19 = vpop.f32.mrb[20].mxu0 }
 0x10d   : > { %v429_v20 = vpop.f32.mrb[21].mxu0 }
 0x10e   : > { %v2413_v21 = vadd.f32 %v429_v20, %v427_v19 }
 0x110   : > { %498 = vmax.xlane.f32.xlu0 %v2413_v21  ;;  %v433_v22 = vpop.f32.mrb[22].mxu0 }
 0x111   : > { %v435_v23 = vpop.f32.mrb[23].mxu0 }
 0x112   : > { %v2416_v24 = vadd.f32 %v435_v23, %v433_v22 }
 0x114   : > { %500 = vmax.xlane.f32.xlu1 %v2416_v24  ;;  %v439_v25 = vpop.f32.mrb[24].mxu0 }
 0x115   : > { %v441_v26 = vpop.f32.mrb[25].mxu0 }
 0x116   : > { %v2419_v27 = vadd.f32 %v441_v26, %v439_v25 }
 0x118   : > { %502 = vmax.xlane.f32.xlu0 %v2419_v27  ;;  %v445_v28 = vpop.f32.mrb[26].mxu0 }
 0x119   : > { %v447_v29 = vpop.f32.mrb[27].mxu0 }
 0x11a   : > { %v2422_v30 = vadd.f32 %v447_v29, %v445_v28 }
 0x11c   : > { %504 = vmax.xlane.f32.xlu1 %v2422_v30  ;;  %v451_v31 = vpop.f32.mrb[28].mxu0 }
 0x11d   : > { %v453_v32 = vpop.f32.mrb[29].mxu0 }
 0x11e   : > { %v2425_v33 = vadd.f32 %v453_v32, %v451_v31 }
 0x120   : > { %506 = vmax.xlane.f32.xlu0 %v2425_v33  ;;  %v457_v34 = vpop.f32.mrb[30].mxu0 }
 0x121   : > { %v459_v35 = vpop.f32.mrb[31].mxu0 }
 0x122   : > { %v2428_v36 = vadd.f32 %v459_v35, %v457_v34 }
 0x124   : > { %508 = vmax.xlane.f32.xlu1 %v2428_v36 }
 0x175   : > { %v2431_v37 = vpop.xlane.xlu0 %478 }
 0x176   : > { %v510_v38 = vsub.f32 %v2359_v43, %v2431_v37 }
 0x178   : > { %v526_v39 = vmul.f32 1.442695, %v510_v38 }
 0x179   : > { %v2435_v40 = vpop.xlane.xlu0 %480 }
 0x17a   : > { %v511_v41 = vsub.f32 %v2362_v46, %v2435_v40  ;;  %2028 = vpow2.f32 %v526_v39 }
 0x17c   : > { %v528_v42 = vmul.f32 1.442695, %v511_v41 }
 0x17d   : > { %v2439_v44 = vpop.xlane.xlu1 %482 }
 0x17e   : > { %2030 = vpow2.f32 %v528_v42  ;;  %v512_v45 = vsub.f32 %v2365_v49, %v2439_v44 }
 0x180   : > { %v530_v47 = vmul.f32 1.442695, %v512_v45 }
 0x181   : > { %v2443_v48 = vpop.xlane.xlu1 %484 }
 0x182   : > { %2032 = vpow2.f32 %v530_v47  ;;  %v513_v43 = vsub.f32 %v2368_v52, %v2443_v48 }
 0x184   : > { %v2029_v50 = vpop.eup %2028  ;;  %v532_v51 = vmul.f32 1.442695, %v513_v43 }
 0x185   : > { %1853 = vmatprep.mubr.f32.mxu1 %v2029_v50  ;;  %v2447_v53 = vpop.xlane.xlu0 %486 }
 0x186   : > { %2034 = vpow2.f32 %v532_v51  ;;  %v514_v46 = vsub.f32 %v2371_v55, %v2447_v53 }
 0x188   : > { %v2031_v54 = vpop.eup %2030  ;;  %v534_v56 = vmul.f32 1.442695, %v514_v46 }
 0x189   : > { %1854 = vmatmul.mubr.f32.vlgmr.msra.gmra.mrb[0].mxu1 %v2031_v54  ;;  %v2451_v49 = vpop.xlane.xlu1 %488 }
 0x18a   : > { %2036 = vpow2.f32 %v534_v56  ;;  %v515_v57 = vsub.f32 %v2380_v61, %v2451_v49 }
 0x18c   : > { %v2033_v58 = vpop.eup %2032  ;;  %v536_v52 = vmul.f32 1.442695, %v515_v57 }
 0x18d   : > { %1856 = vmatprep.mubr.f32.mxu1 %v2033_v58  ;;  %v2455_v59 = vpop.xlane.xlu0 %490 }
 0x18e   : > { %2038 = vpow2.f32 %v536_v52  ;;  %v516_v60 = vsub.f32 %v2389_v3, %v2455_v59 }
 0x190   : > { %v2035_v62 = vpop.eup %2034  ;;  %v538_v55 = vmul.f32 1.442695, %v516_v60 }
 0x191   : > { %1857 = vmatmul.mubr.f32.gmra.mrb[2].mxu1 %v2035_v62  ;;  %v2459_v63 = vpop.xlane.xlu1 %492 }
 0x192   : > { %2040 = vpow2.f32 %v538_v55  ;;  %v517_v0 = vsub.f32 %v2398_v9, %v2459_v63 }
 0x194   : > { %v2037_v1 = vpop.eup %2036  ;;  %v540_v61 = vmul.f32 1.442695, %v517_v0 }
 0x195   : > { %1859 = vmatprep.mubr.f32.mxu1 %v2037_v1  ;;  %v2463_v2 = vpop.xlane.xlu0 %494 }
 0x196   : > { %2042 = vpow2.f32 %v540_v61  ;;  %v518_v4 = vsub.f32 %v2407_v15, %v2463_v2 }
 0x198   : > { %v2039_v5 = vpop.eup %2038  ;;  %v542_v3 = vmul.f32 1.442695, %v518_v4 }
 0x199   : > { %1860 = vmatmul.mubr.f32.gmra.mrb[4].mxu1 %v2039_v5  ;;  %v2467_v6 = vpop.xlane.xlu1 %496 }
 0x19a   : > { %2044 = vpow2.f32 %v542_v3  ;;  %v519_v7 = vsub.f32 %v2410_v18, %v2467_v6 }
 0x19c   : > { %v2041_v8 = vpop.eup %2040  ;;  %v544_v9 = vmul.f32 1.442695, %v519_v7 }
 0x19d   : > { %1862 = vmatprep.mubr.f32.mxu1 %v2041_v8  ;;  %v2471_v10 = vpop.xlane.xlu0 %498 }
 0x19e   : > { %2046 = vpow2.f32 %v544_v9  ;;  %v520_v11 = vsub.f32 %v2413_v21, %v2471_v10 }
 0x1a0   : > { %v2043_v12 = vpop.eup %2042  ;;  %v546_v13 = vmul.f32 1.442695, %v520_v11 }
 0x1a1   : > { %1863 = vmatmul.mubr.f32.gmra.mrb[6].mxu1 %v2043_v12  ;;  %v2475_v14 = vpop.xlane.xlu1 %500 }
 0x1a2   : > { %2048 = vpow2.f32 %v546_v13  ;;  %v521_v15 = vsub.f32 %v2416_v24, %v2475_v14 }
 0x1a4   : > { %v2045_v16 = vpop.eup %2044  ;;  %v548_v17 = vmul.f32 1.442695, %v521_v15 }
 0x1a5   : > { %1865 = vmatprep.mubr.f32.mxu1 %v2045_v16  ;;  %v2479_v18 = vpop.xlane.xlu0 %502 }
 0x1a6   : > { %2050 = vpow2.f32 %v548_v17  ;;  %v522_v19 = vsub.f32 %v2419_v27, %v2479_v18 }
 0x1a8   : > { %v2047_v20 = vpop.eup %2046  ;;  %v550_v21 = vmul.f32 1.442695, %v522_v19 }
 0x1a9   : > { %1866 = vmatmul.mubr.f32.gmra.mrb[8].mxu1 %v2047_v20  ;;  %v2483_v22 = vpop.xlane.xlu1 %504 }
 0x1aa   : > { %2052 = vpow2.f32 %v550_v21  ;;  %v523_v23 = vsub.f32 %v2422_v30, %v2483_v22 }
 0x1ac   : > { %v2049_v25 = vpop.eup %2048  ;;  %v552_v24 = vmul.f32 1.442695, %v523_v23 }
 0x1ad   : > { %1868 = vmatprep.mubr.f32.mxu1 %v2049_v25  ;;  %v2487_v26 = vpop.xlane.xlu0 %506 }
 0x1ae   : > { %2054 = vpow2.f32 %v552_v24  ;;  %v524_v28 = vsub.f32 %v2425_v33, %v2487_v26 }
 0x1b0   : > { %v2051_v29 = vpop.eup %2050  ;;  %v554_v27 = vmul.f32 1.442695, %v524_v28 }
 0x1b1   : > { %1869 = vmatmul.mubr.f32.gmra.mrb[10].mxu1 %v2051_v29  ;;  %v2491_v31 = vpop.xlane.xlu1 %508 }
 0x1b2   : > { %2056 = vpow2.f32 %v554_v27  ;;  %v525_v32 = vsub.f32 %v2428_v36, %v2491_v31 }
 0x1b4   : > { %v2053_v34 = vpop.eup %2052  ;;  %v556_v30 = vmul.f32 1.442695, %v525_v32 }
 0x1b5   : > { %1871 = vmatprep.mubr.f32.mxu1 %v2053_v34 }
 0x1b6   : > { %2058 = vpow2.f32 %v556_v30 }
 0x1b8   : > { %v2055_v35 = vpop.eup %2054 }
 0x1b9   : > { %1872 = vmatmul.mubr.f32.gmra.mrb[12].mxu1 %v2055_v35 }
 0x1bc   : > { %v2057_v38 = vpop.eup %2056 }
 0x1bd   : > { %1874 = vmatprep.mubr.f32.mxu1 %v2057_v38 }
 0x1c0   : > { %v2059_v39 = vpop.eup %2058 }
 0x1c1   : > { %1875 = vmatmul.mubr.f32.gmra.mrb[14].mxu1 %v2059_v39 }
 0x25c   : > { %v1855_v33 = vpop.f32.mrb[0].mxu1 }
 0x25d   : > { %2060 = vlog2.f32 %v1855_v33  ;;  %v640_v41 = vpop.f32.mrb[1].mxu1 }
 0x25e   : > { %2062 = vlog2.f32 %v640_v41 }
 0x264   : > { %v1858_v42 = vpop.f32.mrb[2].mxu1 }
 0x265   : > { %2064 = vlog2.f32 %v1858_v42  ;;  %v650_v45 = vpop.f32.mrb[3].mxu1 }
 0x266   : > { %2066 = vlog2.f32 %v650_v45 }
 0x267   : > { %v2061_v47 = vpop.eup %2060 }
 0x268   : > { %v2063_v36 = vpop.eup %2062  ;;  %v722_v43 = vmul.f32 0.6931472, %v2061_v47 }
 0x269   : > { %v720_v50 = vmul.f32 0.6931472, %v2063_v36 }
 0x26a   : > { %v2496_v51 = vadd.f32 %v722_v43, %v2435_v40 }
 0x26b   : > { %v2499_v46 = vadd.f32 %v720_v50, %v2431_v37 }
 0x26c   : > { %v1861_v54 = vpop.f32.mrb[4].mxu1  ;;  %785 = vrot.lane.b32.xlu1 %v2496_v51, %s2229_s28 }
 0x26d   : > { %2068 = vlog2.f32 %v1861_v54  ;;  %v660_v56 = vpop.f32.mrb[5].mxu1  ;;  %783 = vrot.lane.b32.xlu0 %v2499_v46, %s2229_s28 }
 0x26e   : > { %2070 = vlog2.f32 %v660_v56  ;;  %v944_v56 = vld [vmem:[%s3056_s3] sm:$0xff] }
 0x26f   : > { %v2065_v57 = vpop.eup %2064 }
 0x270   : > { %v2067_v58 = vpop.eup %2066  ;;  %v726_v60 = vmul.f32 0.6931472, %v2065_v57  ;;  %v945_v57 = vld [vmem:[%s3056_s3 + $0x8] sm:$0xff] }
 0x271   : > { %v724_v52 = vmul.f32 0.6931472, %v2067_v58 }
 0x272   : > { %v2511_v0 = vadd.f32 %v726_v60, %v2443_v48  ;;  %v1989_v60 = vpack.c.bf16 %v945_v57, %v944_v56 }
 0x273   : > { %v2506_v40 = vadd.f32 %v724_v52, %v2439_v44 }
 0x274   : > { %v1864_v37 = vpop.f32.mrb[6].mxu1  ;;  %1990 = vmatprep.subr.bf16.mxu1 %v1989_v60 }
 0x275   : > { %2072 = vlog2.f32 %v1864_v37  ;;  %v670_v62 = vpop.f32.mrb[7].mxu1  ;;  %787 = vrot.lane.b32.xlu1 %v2506_v40, %s2229_s28  ;;  %1992 = vmatpush3.bf16.msra.mxu1 %v1989_v60 }
 0x276   : > { %2074 = vlog2.f32 %v670_v62 }
 0x277   : > { %v2069_v55 = vpop.eup %2068 }
 0x278   : > { %v2071_v1 = vpop.eup %2070  ;;  %v730_v61 = vmul.f32 0.6931472, %v2069_v55 }
 0x279   : > { %v728_v4 = vmul.f32 0.6931472, %v2071_v1  ;;  %789 = vrot.lane.b32.xlu1 %v2511_v0, %s2229_s28  ;;  %v947_v1 = vld [vmem:[%s3056_s3 + $0x18] sm:$0xff] }
 0x27a   : > { %v2516_v44 = vadd.f32 %v730_v61, %v2451_v49 }
 0x27b   : > { %v2519_v5 = vadd.f32 %v728_v4, %v2447_v53  ;;  %v948_v4 = vld [vmem:[%s3056_s3 + $0x20] sm:$0xff] }
 0x27c   : > { %v1867_v3 = vpop.f32.mrb[8].mxu1 }
 0x27d   : > { %2076 = vlog2.f32 %v1867_v3  ;;  %v680_v7 = vpop.f32.mrb[9].mxu1  ;;  %791 = vrot.lane.b32.xlu0 %v2519_v5, %s2229_s28  ;;  %793 = vrot.lane.b32.xlu1 %v2516_v44, %s2229_s28 }
 0x27e   : > { %2078 = vlog2.f32 %v680_v7 }
 0x27f   : > { %v2073_v48 = vpop.eup %2072 }
 0x280   : > { %v2075_v8 = vpop.eup %2074  ;;  %v734_v9 = vmul.f32 0.6931472, %v2073_v48 }
 0x281   : > { %v732_v11 = vmul.f32 0.6931472, %v2075_v8 }
 0x282   : > { %v2526_v49 = vadd.f32 %v734_v9, %v2459_v63 }
 0x283   : > { %v2529_v53 = vadd.f32 %v732_v11, %v2455_v59 }
 0x284   : > { %v1870_v12 = vpop.f32.mrb[10].mxu1  ;;  %797 = vrot.lane.b32.xlu1 %v2526_v49, %s2229_s28 }
 0x285   : > { %2080 = vlog2.f32 %v1870_v12  ;;  %v690_v13 = vpop.f32.mrb[11].mxu1  ;;  %795 = vrot.lane.b32.xlu0 %v2529_v53, %s2229_s28 }
 0x286   : > { %2082 = vlog2.f32 %v690_v13  ;;  %v950_v13 = vld [vmem:[%s3056_s3 + $0x30] sm:$0xff] }
 0x287   : > { %v2077_v15 = vpop.eup %2076 }
 0x288   : > { %v2079_v16 = vpop.eup %2078  ;;  %v738_v17 = vmul.f32 0.6931472, %v2077_v15 }
 0x289   : > { %v736_v19 = vmul.f32 0.6931472, %v2079_v16 }
 0x28a   : > { %v2536_v63 = vadd.f32 %v738_v17, %v2467_v6 }
 0x28b   : > { %v2539_v59 = vadd.f32 %v736_v19, %v2463_v2 }
 0x28c   : > { %v1873_v20 = vpop.f32.mrb[12].mxu1  ;;  %801 = vrot.lane.b32.xlu1 %v2536_v63, %s2229_s28 }
 0x28d   : > { %2084 = vlog2.f32 %v1873_v20  ;;  %v700_v21 = vpop.f32.mrb[13].mxu1  ;;  %799 = vrot.lane.b32.xlu0 %v2539_v59, %s2229_s28 }
 0x28e   : > { %2086 = vlog2.f32 %v700_v21 }
 0x28f   : > { %v2081_v23 = vpop.eup %2080 }
 0x290   : > { %v2083_v25 = vpop.eup %2082  ;;  %v742_v24 = vmul.f32 0.6931472, %v2081_v23 }
 0x291   : > { %v740_v28 = vmul.f32 0.6931472, %v2083_v25 }
 0x292   : > { %v2546_v6 = vadd.f32 %v742_v24, %v2475_v14 }
 0x293   : > { %v2549_v2 = vadd.f32 %v740_v28, %v2471_v10 }
 0x294   : > { %805 = vrot.lane.b32.xlu1 %v2546_v6, %s2229_s28  ;;  %v1876_v29 = vpop.f32.mrb[14].mxu1 }
 0x295   : > { %2088 = vlog2.f32 %v1876_v29  ;;  %803 = vrot.lane.b32.xlu0 %v2549_v2, %s2229_s28  ;;  %v710_v27 = vpop.f32.mrb[15].mxu1 }
 0x296   : > { %2090 = vlog2.f32 %v710_v27 }
 0x297   : > { %v2085_v32 = vpop.eup %2084 }
 0x298   : > { %v2087_v34 = vpop.eup %2086  ;;  %v746_v30 = vmul.f32 0.6931472, %v2085_v32 }
 0x299   : > { %v744_v35 = vmul.f32 0.6931472, %v2087_v34 }
 0x29a   : > { %v2556_v14 = vadd.f32 %v746_v30, %v2483_v22 }
 0x29b   : > { %v2559_v10 = vadd.f32 %v744_v35, %v2479_v18 }
 0x29c   : > { %809 = vrot.lane.b32.xlu1 %v2556_v14, %s2229_s28 }
 0x29d   : > { %807 = vrot.lane.b32.xlu0 %v2559_v10, %s2229_s28 }
 0x29f   : > { %v2089_v38 = vpop.eup %2088 }
 0x2a0   : > { %v2091_v39 = vpop.eup %2090  ;;  %v750_v33 = vmul.f32 0.6931472, %v2089_v38 }
 0x2a1   : > { %v748_v41 = vmul.f32 0.6931472, %v2091_v39 }
 0x2a2   : > { %v2566_v42 = vadd.f32 %v750_v33, %v2491_v31 }
 0x2a3   : > { %v2569_v45 = vadd.f32 %v748_v41, %v2487_v26 }
 0x2a4   : > { %813 = vrot.lane.b32.xlu1 %v2566_v42, %s2229_s28 }
 0x2a5   : > { %811 = vrot.lane.b32.xlu0 %v2569_v45, %s2229_s28 }
 0x2de   : > { %v786_v18 = vpop.permute.xlu1 %785 }
 0x2df   : > { %v2576_v22 = vadd.f32 %v786_v18, %v2496_v51  ;;  %v784_v47 = vpop.permute.xlu0 %783 }
 0x2e0   : > { %v2579_v36 = vadd.f32 %v784_v47, %v2499_v46 }
 0x2e1   : > { %v851_v31 = vsel %vm847_vm1, %v2576_v22, -inf }
 0x2e2   : > { %852 = vmax.xlane.f32.xlu1 %v851_v31  ;;  %v848_v26 = vsel %vm847_vm1, %v2579_v36, -inf }
 0x2e3   : > { %849 = vmax.xlane.f32.xlu0 %v848_v26 }
 0x2e7   : > { %v788_v43 = vpop.permute.xlu1 %787 }
 0x2e8   : > { %v2589_v51 = vadd.f32 %v788_v43, %v2506_v40 }
 0x2ea   : > { %v854_v62 = vsel %vm847_vm1, %v2589_v51, -inf }
 0x2eb   : > { %v790_v50 = vpop.permute.xlu1 %789 }
 0x2ec   : > { %v2586_v54 = vadd.f32 %v790_v50, %v2511_v0  ;;  %v946_v0 = vld [vmem:[%s3056_s3 + $0x10] sm:$0xff] }
 0x2ed   : > { %v1993_v61 = vpack.c.bf16 %v947_v1, %v946_v0 }
 0x2ee   : > { %v857_v46 = vsel %vm847_vm1, %v2586_v54, -inf }
 0x2ef   : > { %v792_v58 = vpop.permute.xlu0 %791  ;;  %858 = vmax.xlane.f32.xlu0 %v857_v46  ;;  %v794_v52 = vpop.permute.xlu1 %793  ;;  %1994 = vmatprep.subr.bf16.mxu1 %v1993_v61 }
 0x2f0   : > { %v2600_v37 = vadd.f32 %v794_v52, %v2516_v44  ;;  %v2603_v40 = vadd.f32 %v792_v58, %v2519_v5  ;;  %v949_v44 = vld [vmem:[%s3056_s3 + $0x28] sm:$0xff]  ;;  %1996 = vmatpush3.bf16.msra.mxu1 %v1993_v61 }
 0x2f1   : > { %v1997_v7 = vpack.c.bf16 %v949_v44, %v948_v4 }
 0x2f2   : > { %v863_v55 = vsel %vm847_vm1, %v2600_v37, -inf  ;;  %v860_v3 = vsel %vm847_vm1, %v2603_v40, -inf }
 0x2f3   : > { %855 = vmax.xlane.f32.xlu0 %v854_v62  ;;  %864 = vmax.xlane.f32.xlu1 %v863_v55 }
 0x2f4   : > { %1998 = vmatprep.subr.bf16.mxu1 %v1997_v7 }
 0x2f5   : > { %2000 = vmatpush3.bf16.msra.mxu1 %v1997_v7 }
 0x2f6   : > { %v798_v5 = vpop.permute.xlu1 %797 }
 0x2f7   : > { %v2624_v48 = vadd.f32 %v798_v5, %v2526_v49  ;;  %v796_v8 = vpop.permute.xlu0 %795  ;;  %861 = vmax.xlane.f32.xlu0 %v860_v3  ;;  %v951_v49 = vld [vmem:[%s3056_s3 + $0x38] sm:$0xff] }
 0x2f8   : > { %v2627_v9 = vadd.f32 %v796_v8, %v2529_v53  ;;  %v2001_v53 = vpack.c.bf16 %v951_v49, %v950_v13 }
 0x2f9   : > { %v869_v11 = vsel %vm847_vm1, %v2624_v48, -inf }
 0x2fa   : > { %870 = vmax.xlane.f32.xlu1 %v869_v11  ;;  %v866_v12 = vsel %vm847_vm1, %v2627_v9, -inf  ;;  %2002 = vmatprep.subr.bf16.mxu1 %v2001_v53 }
 0x2fb   : > { %867 = vmax.xlane.f32.xlu0 %v866_v12  ;;  %2004 = vmatpush3.bf16.msra.mxu1 %v2001_v53 }
 0x2fe   : > { %v802_v15 = vpop.permute.xlu1 %801 }
 0x2ff   : > { %v2640_v16 = vadd.f32 %v802_v15, %v2536_v63  ;;  %v800_v17 = vpop.permute.xlu0 %799 }
 0x300   : > { %v2643_v19 = vadd.f32 %v800_v17, %v2539_v59 }
 0x301   : > { %v875_v20 = vsel %vm847_vm1, %v2640_v16, -inf }
 0x302   : > { %876 = vmax.xlane.f32.xlu1 %v875_v20  ;;  %v872_v21 = vsel %vm847_vm1, %v2643_v19, -inf }
 0x303   : > { %873 = vmax.xlane.f32.xlu0 %v872_v21 }
 0x306   : > { %v806_v23 = vpop.permute.xlu1 %805 }
 0x307   : > { %v2650_v25 = vadd.f32 %v806_v23, %v2546_v6  ;;  %v804_v24 = vpop.permute.xlu0 %803 }
 0x308   : > { %v2653_v63 = vadd.f32 %v804_v24, %v2549_v2 }
 0x309   : > { %v881_v59 = vsel %vm847_vm1, %v2650_v25, -inf }
 0x30a   : > { %882 = vmax.xlane.f32.xlu1 %v881_v59  ;;  %v878_v28 = vsel %vm847_vm1, %v2653_v63, -inf }
 0x30b   : > { %879 = vmax.xlane.f32.xlu0 %v878_v28 }
 0x30e   : > { %v810_v29 = vpop.permute.xlu1 %809 }
 0x30f   : > { %v2660_v27 = vadd.f32 %v810_v29, %v2556_v14  ;;  %v808_v32 = vpop.permute.xlu0 %807 }
 0x310   : > { %v2663_v6 = vadd.f32 %v808_v32, %v2559_v10 }
 0x311   : > { %v887_v2 = vsel %vm847_vm1, %v2660_v27, -inf }
 0x312   : > { %888 = vmax.xlane.f32.xlu1 %v887_v2  ;;  %v884_v34 = vsel %vm847_vm1, %v2663_v6, -inf }
 0x313   : > { %885 = vmax.xlane.f32.xlu0 %v884_v34 }
 0x316   : > { %v814_v30 = vpop.permute.xlu1 %813 }
 0x317   : > { %v2670_v35 = vadd.f32 %v814_v30, %v2566_v42  ;;  %v812_v38 = vpop.permute.xlu0 %811 }
 0x318   : > { %v2673_v14 = vadd.f32 %v812_v38, %v2569_v45 }
 0x319   : > { %v893_v10 = vsel %vm847_vm1, %v2670_v35, -inf }
 0x31a   : > { %894 = vmax.xlane.f32.xlu1 %v893_v10  ;;  %v890_v39 = vsel %vm847_vm1, %v2673_v14, -inf }
 0x31b   : > { %891 = vmax.xlane.f32.xlu0 %v890_v39 }
 0x36f   : > { %v2679_v33 = vpop.xlane.xlu1 %852 }
 0x370   : > { %v897_v41 = vsub.f32 %v2576_v22, %v2679_v33  ;;  %v2683_v18 = vpop.xlane.xlu0 %849 }
 0x371   : > { %v896_v42 = vsub.f32 %v2579_v36, %v2683_v18 }
 0x372   : > { %v914_v45 = vmul.f32 1.442695, %v897_v41 }
 0x373   : > { %v912_v47 = vmul.f32 1.442695, %v896_v42 }
 0x375   : > { %2092 = vpow2.f32 %v912_v47 }
 0x376   : > { %2094 = vpow2.f32 %v914_v45 }
 0x37c   : > { %v2687_v31 = vpop.xlane.xlu0 %858 }
 0x37d   : > { %v899_v26 = vsub.f32 %v2586_v54, %v2687_v31 }
 0x37f   : > { %v2093_v43 = vpop.eup %2092  ;;  %v918_v56 = vmul.f32 1.442695, %v899_v26 }
 0x380   : > { %v2095_v50 = vpop.eup %2094  ;;  %1893 = vmatprep.mubr.msk.f32.mxu1 %vm847_vm1, %v2093_v43  ;;  %v2692_v46 = vpop.xlane.xlu0 %855 }
 0x381   : > { %v2694_v22 = vpop.xlane.xlu1 %864  ;;  %v898_v36 = vsub.f32 %v2589_v51, %v2692_v46  ;;  %1894 = vmatmul.mubr.msk.f32.vlgmr.msra.gmra.mrb[16].mxu1 %vm847_vm1, %v2095_v50 }
 0x382   : > { %v901_v57 = vsub.f32 %v2600_v37, %v2694_v22 }
 0x383   : > { %v916_v58 = vmul.f32 1.442695, %v898_v36 }
 0x384   : > { %v2701_v52 = vpop.xlane.xlu0 %861  ;;  %v922_v60 = vmul.f32 1.442695, %v901_v57 }
 0x385   : > { %2096 = vpow2.f32 %v916_v58  ;;  %v900_v54 = vsub.f32 %v2603_v40, %v2701_v52 }
 0x386   : > { %2098 = vpow2.f32 %v918_v56 }
 0x387   : > { %v920_v62 = vmul.f32 1.442695, %v900_v54  ;;  %v2705_v55 = vpop.xlane.xlu1 %870 }
 0x388   : > { %v903_v51 = vsub.f32 %v2624_v48, %v2705_v55  ;;  %v2709_v0 = vpop.xlane.xlu0 %867 }
 0x389   : > { %2100 = vpow2.f32 %v920_v62  ;;  %v902_v37 = vsub.f32 %v2627_v9, %v2709_v0 }
 0x38a   : > { %2102 = vpow2.f32 %v922_v60  ;;  %v926_v1 = vmul.f32 1.442695, %v903_v51 }
 0x38b   : > { %v924_v61 = vmul.f32 1.442695, %v902_v37 }
 0x38d   : > { %2104 = vpow2.f32 %v924_v61 }
 0x38e   : > { %2106 = vpow2.f32 %v926_v1 }
 0x38f   : > { %v2097_v40 = vpop.eup %2096  ;;  %v2713_v4 = vpop.xlane.xlu1 %876 }
 0x390   : > { %v2099_v44 = vpop.eup %2098  ;;  %v905_v5 = vsub.f32 %v2640_v16, %v2713_v4  ;;  %v2717_v3 = vpop.xlane.xlu0 %873  ;;  %1896 = vmatprep.mubr.msk.f32.mxu1 %vm847_vm1, %v2097_v40 }
 0x391   : > { %v904_v7 = vsub.f32 %v2643_v19, %v2717_v3  ;;  %1897 = vmatmul.mubr.msk.f32.gmra.mrb[18].mxu1 %vm847_vm1, %v2099_v44 }
 0x392   : > { %v930_v48 = vmul.f32 1.442695, %v905_v5 }
 0x393   : > { %v2101_v8 = vpop.eup %2100  ;;  %v928_v9 = vmul.f32 1.442695, %v904_v7 }
 0x394   : > { %v2103_v11 = vpop.eup %2102  ;;  %1899 = vmatprep.mubr.msk.f32.mxu1 %vm847_vm1, %v2101_v8 }
 0x395   : > { %2108 = vpow2.f32 %v928_v9  ;;  %1900 = vmatmul.mubr.msk.f32.gmra.mrb[20].mxu1 %vm847_vm1, %v2103_v11 }
 0x396   : > { %2110 = vpow2.f32 %v930_v48 }
 0x397   : > { %v2105_v12 = vpop.eup %2104  ;;  %v2725_v13 = vpop.xlane.xlu1 %882 }
 0x398   : > { %v2107_v49 = vpop.eup %2106  ;;  %v907_v53 = vsub.f32 %v2650_v25, %v2725_v13  ;;  %v2729_v15 = vpop.xlane.xlu0 %879  ;;  %1902 = vmatprep.mubr.msk.f32.mxu1 %vm847_vm1, %v2105_v12 }
 0x399   : > { %v906_v16 = vsub.f32 %v2653_v63, %v2729_v15  ;;  %1903 = vmatmul.mubr.msk.f32.gmra.mrb[22].mxu1 %vm847_vm1, %v2107_v49 }
 0x39a   : > { %v934_v17 = vmul.f32 1.442695, %v907_v53 }
 0x39b   : > { %v932_v19 = vmul.f32 1.442695, %v906_v16 }
 0x39d   : > { %2112 = vpow2.f32 %v932_v19 }
 0x39e   : > { %2114 = vpow2.f32 %v934_v17 }
 0x39f   : > { %v2109_v20 = vpop.eup %2108  ;;  %v2735_v21 = vpop.xlane.xlu1 %888 }
 0x3a0   : > { %v2111_v23 = vpop.eup %2110  ;;  %v909_v25 = vsub.f32 %v2660_v27, %v2735_v21  ;;  %v2739_v24 = vpop.xlane.xlu0 %885  ;;  %1905 = vmatprep.mubr.msk.f32.mxu1 %vm847_vm1, %v2109_v20 }
 0x3a1   : > { %v908_v63 = vsub.f32 %v2663_v6, %v2739_v24  ;;  %1906 = vmatmul.mubr.msk.f32.gmra.mrb[24].mxu1 %vm847_vm1, %v2111_v23 }
 0x3a2   : > { %v938_v59 = vmul.f32 1.442695, %v909_v25 }
 0x3a3   : > { %v936_v28 = vmul.f32 1.442695, %v908_v63 }
 0x3a5   : > { %2116 = vpow2.f32 %v936_v28 }
 0x3a6   : > { %2118 = vpow2.f32 %v938_v59 }
 0x3a7   : > { %v2113_v29 = vpop.eup %2112  ;;  %v2745_v32 = vpop.xlane.xlu1 %894 }
 0x3a8   : > { %v2115_v2 = vpop.eup %2114  ;;  %v911_v27 = vsub.f32 %v2670_v35, %v2745_v32  ;;  %v2749_v34 = vpop.xlane.xlu0 %891  ;;  %1908 = vmatprep.mubr.msk.f32.mxu1 %vm847_vm1, %v2113_v29 }
 0x3a9   : > { %v910_v6 = vsub.f32 %v2673_v14, %v2749_v34  ;;  %1909 = vmatmul.mubr.msk.f32.gmra.mrb[26].mxu1 %vm847_vm1, %v2115_v2 }
 0x3aa   : > { %v942_v30 = vmul.f32 1.442695, %v911_v27 }
 0x3ab   : > { %v940_v38 = vmul.f32 1.442695, %v910_v6 }
 0x3ad   : > { %2120 = vpow2.f32 %v940_v38 }
 0x3ae   : > { %2122 = vpow2.f32 %v942_v30 }
 0x3af   : > { %v2117_v10 = vpop.eup %2116 }
 0x3b0   : > { %v2119_v39 = vpop.eup %2118  ;;  %1911 = vmatprep.mubr.msk.f32.mxu1 %vm847_vm1, %v2117_v10 }
 0x3b1   : > { %1912 = vmatmul.mubr.msk.f32.gmra.mrb[28].mxu1 %vm847_vm1, %v2119_v39 }
 0x3b7   : > { %v2121_v35 = vpop.eup %2120 }
 0x3b8   : > { %v2123_v41 = vpop.eup %2122  ;;  %1914 = vmatprep.mubr.msk.f32.mxu1 %vm847_vm1, %v2121_v35 }
 0x3b9   : > { %1915 = vmatmul.mubr.msk.f32.gmra.mrb[30].mxu1 %vm847_vm1, %v2123_v41  ;;  %v1369_v41 = vld [vmem:[%s3057_s4] sm:$0xff] }
 0x454   : > { %v1895_v42 = vpop.f32.mrb[16].mxu1 }
 0x455   : > { %2124 = vlog2.f32 %v1895_v42  ;;  %v1066_v14 = vpop.f32.mrb[17].mxu1  ;;  %v1370_v42 = vld [vmem:[%s3057_s4 + $0x8] sm:$0xff] }
 0x456   : > { %2126 = vlog2.f32 %v1066_v14 }
 0x45f   : > { %v2125_v45 = vpop.eup %2124 }
 0x460   : > { %v2127_v47 = vpop.eup %2126  ;;  %v1148_v26 = vmul.f32 0.6931472, %v2125_v45  ;;  %v2005_v45 = vpack.c.bf16 %v1370_v42, %v1369_v41 }
 0x461   : > { %v1146_v43 = vmul.f32 0.6931472, %v2127_v47 }
 0x462   : > { %v2760_v50 = vadd.f32 %v1148_v26, %v2679_v33  ;;  %2006 = vmatprep.subr.bf16.mxu0 %v2005_v45  ;;  %2013 = vmatprep.subr.bf16.mxu1 %v2005_v45 }
 0x463   : > { %v2763_v36 = vadd.f32 %v1146_v43, %v2683_v18  ;;  %2008 = vmatpush3.bf16.msra.mxu0 %v2005_v45  ;;  %2015 = vmatpush3.bf16.msra.mxu1 %v2005_v45 }
 0x464   : > { %1211 = vrot.lane.b32.xlu1 %v2760_v50, %s2230_s22  ;;  %v1898_v56 = vpop.f32.mrb[18].mxu1 }
 0x465   : > { %2128 = vlog2.f32 %v1898_v56  ;;  %1209 = vrot.lane.b32.xlu0 %v2763_v36, %s2230_s22  ;;  %v1076_v57 = vpop.f32.mrb[19].mxu1 }
 0x466   : > { %2130 = vlog2.f32 %v1076_v57 }
 0x468   : > { %v1901_v58 = vpop.f32.mrb[20].mxu1 }
 0x469   : > { %2132 = vlog2.f32 %v1901_v58  ;;  %v1086_v54 = vpop.f32.mrb[21].mxu1 }
 0x46a   : > { %2134 = vlog2.f32 %v1086_v54 }
 0x46c   : > { %v1904_v33 = vpop.f32.mrb[22].mxu1 }
 0x46d   : > { %2136 = vlog2.f32 %v1904_v33  ;;  %v1096_v60 = vpop.f32.mrb[23].mxu1 }
 0x46e   : > { %2138 = vlog2.f32 %v1096_v60 }
 0x46f   : > { %v2129_v18 = vpop.eup %2128 }
 0x470   : > { %v2131_v62 = vpop.eup %2130  ;;  %v1152_v51 = vmul.f32 0.6931472, %v2129_v18 }
 0x471   : > { %v1150_v37 = vmul.f32 0.6931472, %v2131_v62 }
 0x472   : > { %v2770_v1 = vadd.f32 %v1152_v51, %v2687_v31 }
 0x473   : > { %v2133_v61 = vpop.eup %2132  ;;  %v2775_v8 = vadd.f32 %v1150_v37, %v2692_v46  ;;  %v1371_v37 = vld [vmem:[%s3057_s4 + $0x10] sm:$0xff] }
 0x474   : > { %v2135_v40 = vpop.eup %2134  ;;  %1215 = vrot.lane.b32.xlu1 %v2770_v1, %s2230_s22  ;;  %v1907_v44 = vpop.f32.mrb[24].mxu1  ;;  %v1156_v48 = vmul.f32 0.6931472, %v2133_v61 }
 0x475   : > { %v1154_v5 = vmul.f32 0.6931472, %v2135_v40  ;;  %2140 = vlog2.f32 %v1907_v44  ;;  %v1106_v7 = vpop.f32.mrb[25].mxu1 }
 0x476   : > { %2142 = vlog2.f32 %v1106_v7  ;;  %v2785_v53 = vadd.f32 %v1156_v48, %v2694_v22 }
 0x477   : > { %v2137_v9 = vpop.eup %2136  ;;  %v2778_v11 = vadd.f32 %v1154_v5, %v2701_v52 }
 0x478   : > { %v2139_v31 = vpop.eup %2138  ;;  %1213 = vrot.lane.b32.xlu1 %v2775_v8, %s2230_s22  ;;  %v1160_v49 = vmul.f32 0.6931472, %v2137_v9 }
 0x479   : > { %v1158_v12 = vmul.f32 0.6931472, %v2139_v31  ;;  %1217 = vrot.lane.b32.xlu0 %v2778_v11, %s2230_s22 }
 0x47a   : > { %v2795_v17 = vadd.f32 %v1160_v49, %v2705_v55 }
 0x47b   : > { %v2788_v16 = vadd.f32 %v1158_v12, %v2709_v0 }
 0x47c   : > { %1219 = vrot.lane.b32.xlu1 %v2785_v53, %s2230_s22  ;;  %v1910_v46 = vpop.f32.mrb[26].mxu1 }
 0x47d   : > { %2144 = vlog2.f32 %v1910_v46  ;;  %1221 = vrot.lane.b32.xlu0 %v2788_v16, %s2230_s22  ;;  %v1116_v52 = vpop.f32.mrb[27].mxu1 }
 0x47e   : > { %2146 = vlog2.f32 %v1116_v52 }
 0x47f   : > { %v2141_v19 = vpop.eup %2140 }
 0x480   : > { %v2143_v20 = vpop.eup %2142  ;;  %v1164_v22 = vmul.f32 0.6931472, %v2141_v19  ;;  %1223 = vrot.lane.b32.xlu1 %v2795_v17, %s2230_s22 }
 0x481   : > { %v1162_v0 = vmul.f32 0.6931472, %v2143_v20 }
 0x482   : > { %v2800_v23 = vadd.f32 %v1164_v22, %v2713_v4 }
 0x483   : > { %v2803_v25 = vadd.f32 %v1162_v0, %v2717_v3 }
 0x484   : > { %1227 = vrot.lane.b32.xlu1 %v2800_v23, %s2230_s22  ;;  %v1913_v63 = vpop.f32.mrb[28].mxu1 }
 0x485   : > { %2148 = vlog2.f32 %v1913_v63  ;;  %1225 = vrot.lane.b32.xlu0 %v2803_v25, %s2230_s22  ;;  %v1126_v55 = vpop.f32.mrb[29].mxu1 }
 0x486   : > { %2150 = vlog2.f32 %v1126_v55 }
 0x487   : > { %v2145_v59 = vpop.eup %2144 }
 0x488   : > { %v2147_v28 = vpop.eup %2146  ;;  %v1168_v29 = vmul.f32 0.6931472, %v2145_v59 }
 0x489   : > { %v1166_v2 = vmul.f32 0.6931472, %v2147_v28 }
 0x48a   : > { %v2810_v4 = vadd.f32 %v1168_v29, %v2725_v13 }
 0x48b   : > { %v2813_v3 = vadd.f32 %v1166_v2, %v2729_v15 }
 0x48c   : > { %1231 = vrot.lane.b32.xlu1 %v2810_v4, %s2230_s22  ;;  %v1916_v27 = vpop.f32.mrb[30].mxu1 }
 0x48d   : > { %2152 = vlog2.f32 %v1916_v27  ;;  %1229 = vrot.lane.b32.xlu0 %v2813_v3, %s2230_s22  ;;  %v1136_v6 = vpop.f32.mrb[31].mxu1 }
 0x48e   : > { %2154 = vlog2.f32 %v1136_v6 }
 0x48f   : > { %v2149_v30 = vpop.eup %2148 }
 0x490   : > { %v2151_v38 = vpop.eup %2150  ;;  %v1172_v39 = vmul.f32 0.6931472, %v2149_v30 }
 0x491   : > { %v1170_v10 = vmul.f32 0.6931472, %v2151_v38 }
 0x492   : > { %v2825_v35 = vadd.f32 %v1172_v39, %v2735_v21 }
 0x493   : > { %v2820_v13 = vadd.f32 %v1170_v10, %v2739_v24 }
 0x495   : > { %1233 = vrot.lane.b32.xlu0 %v2820_v13, %s2230_s22 }
 0x497   : > { %v2153_v15 = vpop.eup %2152 }
 0x498   : > { %v2155_v14 = vpop.eup %2154  ;;  %v1176_v24 = vmul.f32 0.6931472, %v2153_v15 }
 0x499   : > { %v1174_v47 = vmul.f32 0.6931472, %v2155_v14  ;;  %1235 = vrot.lane.b32.xlu0 %v2825_v35, %s2230_s22 }
 0x49a   : > { %v2841_v26 = vadd.f32 %v1176_v24, %v2745_v32 }
 0x49b   : > { %v2836_v21 = vadd.f32 %v1174_v47, %v2749_v34 }
 0x49d   : > { %1237 = vrot.lane.b32.xlu1 %v2836_v21, %s2230_s22 }
 0x4a1   : > { %1239 = vrot.lane.b32.xlu1 %v2841_v26, %s2230_s22 }
 0x4d6   : > { %v1212_v43 = vpop.permute.xlu1 %1211 }
 0x4d7   : > { %v2846_v56 = vadd.f32 %v1212_v43, %v2760_v50  ;;  %v1210_v57 = vpop.permute.xlu0 %1209 }
 0x4d8   : > { %v2849_v58 = vadd.f32 %v1210_v57, %v2763_v36 }
 0x4d9   : > { %v1276_v34 = vsel %vm252_vm0, %v2846_v56, -inf }
 0x4da   : > { %1277 = vmax.xlane.f32.xlu1 %v1276_v34  ;;  %v1273_v54 = vsel %vm252_vm0, %v2849_v58, -inf }
 0x4db   : > { %1274 = vmax.xlane.f32.xlu0 %v1273_v54 }
 0x4e6   : > { %v1216_v32 = vpop.permute.xlu1 %1215 }
 0x4e7   : > { %v2856_v33 = vadd.f32 %v1216_v32, %v2770_v1  ;;  %v1372_v1 = vld [vmem:[%s3057_s4 + $0x18] sm:$0xff] }
 0x4e8   : > { %v2009_v40 = vpack.c.bf16 %v1372_v1, %v1371_v37 }
 0x4e9   : > { %v1282_v50 = vsel %vm252_vm0, %v2856_v33, -inf }
 0x4ea   : > { %1283 = vmax.xlane.f32.xlu0 %v1282_v50  ;;  %v1214_v60 = vpop.permute.xlu1 %1213  ;;  %2010 = vmatprep.subr.bf16.mxu0 %v2009_v40 }
 0x4eb   : > { %v2861_v36 = vadd.f32 %v1214_v60, %v2775_v8  ;;  %v1218_v18 = vpop.permute.xlu0 %1217  ;;  %2014 = vmatprep.subr.bf16.mxu1 %v2009_v40  ;;  %2012 = vmatpush3.bf16.msra.mxu0 %v2009_v40 }
 0x4ec   : > { %v2864_v62 = vadd.f32 %v1218_v18, %v2778_v11  ;;  %2016 = vmatpush3.bf16.msra.mxu1 %v2009_v40 }
 0x4ed   : > { %v1279_v51 = vsel %vm252_vm0, %v2861_v36, -inf }
 0x4ee   : > { %1280 = vmax.xlane.f32.xlu0 %v1279_v51  ;;  %v1220_v61 = vpop.permute.xlu1 %1219  ;;  %v1285_v48 = vsel %vm252_vm0, %v2864_v62, -inf }
 0x4ef   : > { %v2875_v44 = vadd.f32 %v1220_v61, %v2785_v53  ;;  %v1222_v5 = vpop.permute.xlu0 %1221 }
 0x4f0   : > { %v2878_v7 = vadd.f32 %v1222_v5, %v2788_v16 }
 0x4f1   : > { %v1288_v8 = vsel %vm252_vm0, %v2875_v44, -inf }
 0x4f2   : > { %1286 = vmax.xlane.f32.xlu0 %v1285_v48  ;;  %1289 = vmax.xlane.f32.xlu1 %v1288_v8  ;;  %v1224_v9 = vpop.permute.xlu1 %1223  ;;  %v1291_v31 = vsel %vm252_vm0, %v2878_v7, -inf }
 0x4f3   : > { %v2885_v11 = vadd.f32 %v1224_v9, %v2795_v17 }
 0x4f5   : > { %v1294_v12 = vsel %vm252_vm0, %v2885_v11, -inf }
 0x4f6   : > { %1292 = vmax.xlane.f32.xlu0 %v1291_v31  ;;  %1295 = vmax.xlane.f32.xlu1 %v1294_v12  ;;  %v1228_v49 = vpop.permute.xlu1 %1227 }
 0x4f7   : > { %v2892_v53 = vadd.f32 %v1228_v49, %v2800_v23  ;;  %v1226_v16 = vpop.permute.xlu0 %1225 }
 0x4f8   : > { %v2895_v46 = vadd.f32 %v1226_v16, %v2803_v25 }
 0x4f9   : > { %v1300_v52 = vsel %vm252_vm0, %v2892_v53, -inf }
 0x4fa   : > { %1301 = vmax.xlane.f32.xlu1 %v1300_v52  ;;  %v1297_v17 = vsel %vm252_vm0, %v2895_v46, -inf }
 0x4fb   : > { %1298 = vmax.xlane.f32.xlu0 %v1297_v17 }
 0x4fe   : > { %v1232_v19 = vpop.permute.xlu1 %1231 }
 0x4ff   : > { %v2902_v20 = vadd.f32 %v1232_v19, %v2810_v4  ;;  %v1230_v22 = vpop.permute.xlu0 %1229 }
 0x500   : > { %v2905_v0 = vadd.f32 %v1230_v22, %v2813_v3 }
 0x501   : > { %v1306_v23 = vsel %vm252_vm0, %v2902_v20, -inf }
 0x502   : > { %1307 = vmax.xlane.f32.xlu1 %v1306_v23  ;;  %v1303_v25 = vsel %vm252_vm0, %v2905_v0, -inf }
 0x503   : > { %1304 = vmax.xlane.f32.xlu0 %v1303_v25 }
 0x507   : > { %v1234_v63 = vpop.permute.xlu0 %1233 }
 0x508   : > { %v2912_v55 = vadd.f32 %v1234_v63, %v2820_v13 }
 0x50a   : > { %v1309_v59 = vsel %vm252_vm0, %v2912_v55, -inf }
 0x50b   : > { %v1236_v28 = vpop.permute.xlu0 %1235  ;;  %1310 = vmax.xlane.f32.xlu0 %v1309_v59 }
 0x50c   : > { %v2917_v29 = vadd.f32 %v1236_v28, %v2825_v35 }
 0x50e   : > { %v1312_v2 = vsel %vm252_vm0, %v2917_v29, -inf }
 0x50f   : > { %1313 = vmax.xlane.f32.xlu0 %v1312_v2  ;;  %v1238_v4 = vpop.permute.xlu1 %1237 }
 0x510   : > { %v2922_v3 = vadd.f32 %v1238_v4, %v2836_v21 }
 0x512   : > { %v1315_v27 = vsel %vm252_vm0, %v2922_v3, -inf }
 0x513   : > { %1316 = vmax.xlane.f32.xlu1 %v1315_v27  ;;  %v1240_v6 = vpop.permute.xlu1 %1239 }
 0x514   : > { %v2927_v30 = vadd.f32 %v1240_v6, %v2841_v26 }
 0x516   : > { %v1318_v38 = vsel %vm252_vm0, %v2927_v30, -inf }
 0x517   : > { %1319 = vmax.xlane.f32.xlu1 %v1318_v38 }
 0x567   : > { %v2931_v10 = vpop.xlane.xlu1 %1277 }
 0x568   : > { %v1322_v39 = vsub.f32 %v2846_v56, %v2931_v10  ;;  %v2935_v13 = vpop.xlane.xlu0 %1274 }
 0x569   : > { %v1321_v15 = vsub.f32 %v2849_v58, %v2935_v13 }
 0x56a   : > { %v1339_v35 = vmul.f32 1.442695, %v1322_v39 }
 0x56b   : > { %v1337_v41 = vmul.f32 1.442695, %v1321_v15 }
 0x56d   : > { %2156 = vpow2.f32 %v1337_v41 }
 0x56e   : > { %2158 = vpow2.f32 %v1339_v35 }
 0x577   : > { %v2157_v42 = vpop.eup %2156  ;;  %v2939_v14 = vpop.xlane.xlu0 %1283 }
 0x578   : > { %v2159_v45 = vpop.eup %2158  ;;  %1925 = vmatprep.mubr.msk.f32.mxu0 %vm252_vm0, %v2157_v42  ;;  %v1324_v47 = vsub.f32 %v2856_v33, %v2939_v14 }
 0x579   : > { %1926 = vmatmul.mubr.msk.f32.vlgmr.msra.gmra.mrb[32].mxu0 %vm252_vm0, %v2159_v45 }
 0x57a   : > { %v1343_v26 = vmul.f32 1.442695, %v1324_v47 }
 0x57b   : > { %v2945_v24 = vpop.xlane.xlu0 %1280 }
 0x57c   : > { %v1323_v21 = vsub.f32 %v2861_v36, %v2945_v24 }
 0x57e   : > { %v1341_v43 = vmul.f32 1.442695, %v1323_v21 }
 0x57f   : > { %v2949_v56 = vpop.xlane.xlu0 %1286  ;;  %v2951_v57 = vpop.xlane.xlu1 %1289 }
 0x580   : > { %2160 = vpow2.f32 %v1341_v43  ;;  %v1325_v58 = vsub.f32 %v2864_v62, %v2949_v56  ;;  %v1326_v34 = vsub.f32 %v2875_v44, %v2951_v57 }
 0x581   : > { %2162 = vpow2.f32 %v1343_v26 }
 0x582   : > { %v1345_v54 = vmul.f32 1.442695, %v1325_v58  ;;  %v1347_v32 = vmul.f32 1.442695, %v1326_v34 }
 0x583   : > { %v2957_v33 = vpop.xlane.xlu0 %1292  ;;  %v2959_v50 = vpop.xlane.xlu1 %1295 }
 0x584   : > { %2164 = vpow2.f32 %v1345_v54  ;;  %v1327_v60 = vsub.f32 %v2878_v7, %v2957_v33  ;;  %v1328_v36 = vsub.f32 %v2885_v11, %v2959_v50 }
 0x585   : > { %2166 = vpow2.f32 %v1347_v32 }
 0x586   : > { %v1349_v18 = vmul.f32 1.442695, %v1327_v60  ;;  %v1351_v62 = vmul.f32 1.442695, %v1328_v36 }
 0x587   : > { %v2965_v51 = vpop.xlane.xlu1 %1301 }
 0x588   : > { %2168 = vpow2.f32 %v1349_v18  ;;  %v1330_v37 = vsub.f32 %v2892_v53, %v2965_v51  ;;  %v2969_v1 = vpop.xlane.xlu0 %1298 }
 0x589   : > { %2170 = vpow2.f32 %v1351_v62  ;;  %v1329_v61 = vsub.f32 %v2895_v46, %v2969_v1 }
 0x58a   : > { %v2161_v40 = vpop.eup %2160  ;;  %v1355_v44 = vmul.f32 1.442695, %v1330_v37 }
 0x58b   : > { %v2163_v5 = vpop.eup %2162  ;;  %v1353_v7 = vmul.f32 1.442695, %v1329_v61  ;;  %1928 = vmatprep.mubr.msk.f32.mxu0 %vm252_vm0, %v2161_v40 }
 0x58c   : > { %1929 = vmatmul.mubr.msk.f32.gmra.mrb[34].mxu0 %vm252_vm0, %v2163_v5 }
 0x58d   : > { %2172 = vpow2.f32 %v1353_v7 }
 0x58e   : > { %v2165_v48 = vpop.eup %2164  ;;  %2174 = vpow2.f32 %v1355_v44 }
 0x58f   : > { %v2167_v8 = vpop.eup %2166  ;;  %1931 = vmatprep.mubr.msk.f32.mxu0 %vm252_vm0, %v2165_v48  ;;  %v2976_v9 = vpop.xlane.xlu1 %1307 }
 0x590   : > { %v1332_v11 = vsub.f32 %v2902_v20, %v2976_v9  ;;  %v2980_v31 = vpop.xlane.xlu0 %1304  ;;  %1932 = vmatmul.mubr.msk.f32.gmra.mrb[36].mxu0 %vm252_vm0, %v2167_v8 }
 0x591   : > { %v1331_v12 = vsub.f32 %v2905_v0, %v2980_v31 }
 0x592   : > { %v2169_v49 = vpop.eup %2168  ;;  %v1359_v53 = vmul.f32 1.442695, %v1332_v11 }
 0x593   : > { %v2171_v16 = vpop.eup %2170  ;;  %v1357_v46 = vmul.f32 1.442695, %v1331_v12  ;;  %1934 = vmatprep.mubr.msk.f32.mxu0 %vm252_vm0, %v2169_v49 }
 0x594   : > { %1935 = vmatmul.mubr.msk.f32.gmra.mrb[38].mxu0 %vm252_vm0, %v2171_v16 }
 0x595   : > { %2176 = vpow2.f32 %v1357_v46 }
 0x596   : > { %2178 = vpow2.f32 %v1359_v53 }
 0x597   : > { %v2173_v52 = vpop.eup %2172 }
 0x598   : > { %v2175_v17 = vpop.eup %2174  ;;  %v2987_v19 = vpop.xlane.xlu0 %1310  ;;  %1937 = vmatprep.mubr.msk.f32.mxu0 %vm252_vm0, %v2173_v52 }
 0x599   : > { %v1333_v20 = vsub.f32 %v2912_v55, %v2987_v19  ;;  %1938 = vmatmul.mubr.msk.f32.gmra.mrb[40].mxu0 %vm252_vm0, %v2175_v17 }
 0x59b   : > { %v1361_v22 = vmul.f32 1.442695, %v1333_v20 }
 0x59c   : > { %v2993_v0 = vpop.xlane.xlu0 %1313 }
 0x59d   : > { %2180 = vpow2.f32 %v1361_v22  ;;  %v1334_v23 = vsub.f32 %v2917_v29, %v2993_v0 }
 0x59f   : > { %v2177_v25 = vpop.eup %2176  ;;  %v1363_v63 = vmul.f32 1.442695, %v1334_v23 }
 0x5a0   : > { %v2179_v59 = vpop.eup %2178  ;;  %1940 = vmatprep.mubr.msk.f32.mxu0 %vm252_vm0, %v2177_v25  ;;  %v2998_v28 = vpop.xlane.xlu1 %1316 }
 0x5a1   : > { %2182 = vpow2.f32 %v1363_v63  ;;  %v1335_v55 = vsub.f32 %v2922_v3, %v2998_v28  ;;  %1941 = vmatmul.mubr.msk.f32.gmra.mrb[42].mxu0 %vm252_vm0, %v2179_v59 }
 0x5a3   : > { %v1365_v2 = vmul.f32 1.442695, %v1335_v55 }
 0x5a4   : > { %v3003_v4 = vpop.xlane.xlu1 %1319 }
 0x5a5   : > { %2184 = vpow2.f32 %v1365_v2  ;;  %v1336_v29 = vsub.f32 %v2927_v30, %v3003_v4 }
 0x5a7   : > { %v2181_v27 = vpop.eup %2180  ;;  %v1367_v6 = vmul.f32 1.442695, %v1336_v29 }
 0x5a8   : > { %1943 = vmatprep.mubr.msk.f32.mxu0 %vm252_vm0, %v2181_v27 }
 0x5a9   : > { %2186 = vpow2.f32 %v1367_v6 }
 0x5ab   : > { %v2183_v38 = vpop.eup %2182 }
 0x5ac   : > { %1944 = vmatmul.mubr.msk.f32.gmra.mrb[44].mxu0 %vm252_vm0, %v2183_v38 }
 0x5af   : > { %v2185_v39 = vpop.eup %2184 }
 0x5b0   : > { %1946 = vmatprep.mubr.msk.f32.mxu1 %vm252_vm0, %v2185_v39 }
 0x5b3   : > { %v2187_v3 = vpop.eup %2186 }
 0x5b4   : > { %1947 = vmatmul.mubr.msk.f32.vlgmr.msra.gmra.mrb[32].mxu1 %vm252_vm0, %v2187_v3 }
 0x64c   : > { %v1927_v15 = vpop.f32.mrb[32].mxu0 }
 0x64d   : > { %2188 = vlog2.f32 %v1927_v15  ;;  %v1487_v35 = vpop.f32.mrb[33].mxu0 }
 0x64e   : > { %2190 = vlog2.f32 %v1487_v35 }
 0x657   : > { %v2189_v30 = vpop.eup %2188 }
 0x658   : > { %v2191_v41 = vpop.eup %2190  ;;  %v1569_v42 = vmul.f32 0.6931472, %v2189_v30 }
 0x659   : > { %v1567_v45 = vmul.f32 0.6931472, %v2191_v41 }
 0x65a   : > { %v1599_v47 = vadd.f32 %v1569_v42, %v2931_v10 }
 0x65b   : > { %v1598_v21 = vadd.f32 %v1567_v45, %v2935_v13 }
 0x65c   : > { %1615 = vst [vmem:[%s3016_s9 + $0x8] sm:$0xff] %v1599_v47 }
 0x65d   : > { %1614 = vst [vmem:[%s3016_s9] sm:$0xff] %v1598_v21 }
 0x65f   : > { %v1930_v26 = vpop.f32.mrb[34].mxu0 }
 0x660   : > { %2192 = vlog2.f32 %v1930_v26  ;;  %v1497_v43 = vpop.f32.mrb[35].mxu0 }
 0x661   : > { %2194 = vlog2.f32 %v1497_v43 }
 0x663   : > { %v1933_v58 = vpop.f32.mrb[36].mxu0 }
 0x664   : > { %2196 = vlog2.f32 %v1933_v58  ;;  %v1507_v34 = vpop.f32.mrb[37].mxu0 }
 0x665   : > { %2198 = vlog2.f32 %v1507_v34 }
 0x667   : > { %v1936_v54 = vpop.f32.mrb[38].mxu0 }
 0x668   : > { %2200 = vlog2.f32 %v1936_v54  ;;  %v1517_v32 = vpop.f32.mrb[39].mxu0 }
 0x669   : > { %2202 = vlog2.f32 %v1517_v32 }
 0x66a   : > { %v2193_v60 = vpop.eup %2192 }
 0x66b   : > { %v2195_v10 = vpop.eup %2194  ;;  %v1573_v36 = vmul.f32 0.6931472, %v2193_v60 }
 0x66c   : > { %v1571_v13 = vmul.f32 0.6931472, %v2195_v10  ;;  %v1939_v18 = vpop.f32.mrb[40].mxu0 }
 0x66d   : > { %v1601_v62 = vadd.f32 %v1573_v36, %v2939_v14  ;;  %2204 = vlog2.f32 %v1939_v18  ;;  %v1527_v37 = vpop.f32.mrb[41].mxu0 }
 0x66e   : > { %v2197_v61 = vpop.eup %2196  ;;  %v1600_v40 = vadd.f32 %v1571_v13, %v2945_v24  ;;  %2206 = vlog2.f32 %v1527_v37 }
 0x66f   : > { %v2199_v44 = vpop.eup %2198  ;;  %1617 = vst [vmem:[%s3016_s9 + $0x18] sm:$0xff] %v1601_v62  ;;  %v1577_v5 = vmul.f32 0.6931472, %v2197_v61 }
 0x670   : > { %1616 = vst [vmem:[%s3016_s9 + $0x10] sm:$0xff] %v1600_v40  ;;  %v1575_v7 = vmul.f32 0.6931472, %v2199_v44 }
 0x671   : > { %v1603_v48 = vadd.f32 %v1577_v5, %v2951_v57 }
 0x672   : > { %v2201_v8 = vpop.eup %2200  ;;  %v1602_v11 = vadd.f32 %v1575_v7, %v2949_v56 }
 0x673   : > { %v2203_v14 = vpop.eup %2202  ;;  %1619 = vst [vmem:[%s3016_s9 + $0x28] sm:$0xff] %v1603_v48  ;;  %v1581_v12 = vmul.f32 0.6931472, %v2201_v8 }
 0x674   : > { %1618 = vst [vmem:[%s3016_s9 + $0x20] sm:$0xff] %v1602_v11  ;;  %v1579_v49 = vmul.f32 0.6931472, %v2203_v14  ;;  %v1942_v24 = vpop.f32.mrb[42].mxu0 }
 0x675   : > { %v1605_v53 = vadd.f32 %v1581_v12, %v2959_v50  ;;  %2208 = vlog2.f32 %v1942_v24  ;;  %v1537_v16 = vpop.f32.mrb[43].mxu0 }
 0x676   : > { %v1604_v46 = vadd.f32 %v1579_v49, %v2957_v33  ;;  %2210 = vlog2.f32 %v1537_v16 }
 0x677   : > { %v2205_v57 = vpop.eup %2204  ;;  %1621 = vst [vmem:[%s3016_s9 + $0x38] sm:$0xff] %v1605_v53 }
 0x678   : > { %v2207_v52 = vpop.eup %2206  ;;  %1620 = vst [vmem:[%s3016_s9 + $0x30] sm:$0xff] %v1604_v46  ;;  %v1585_v56 = vmul.f32 0.6931472, %v2205_v57 }
 0x679   : > { %v1583_v17 = vmul.f32 0.6931472, %v2207_v52 }
 0x67a   : > { %v1607_v20 = vadd.f32 %v1585_v56, %v2965_v51 }
 0x67b   : > { %v1606_v22 = vadd.f32 %v1583_v17, %v2969_v1 }
 0x67c   : > { %1623 = vst [vmem:[%s3016_s9 + $0x48] sm:$0xff] %v1607_v20 }
 0x67d   : > { %1622 = vst [vmem:[%s3016_s9 + $0x40] sm:$0xff] %v1606_v22 }
 0x67f   : > { %v2209_v50 = vpop.eup %2208  ;;  %v1945_v23 = vpop.f32.mrb[44].mxu0 }
 0x680   : > { %v2211_v25 = vpop.eup %2210  ;;  %v1589_v63 = vmul.f32 0.6931472, %v2209_v50  ;;  %2212 = vlog2.f32 %v1945_v23  ;;  %v1547_v33 = vpop.f32.mrb[45].mxu0 }
 0x681   : > { %v1587_v59 = vmul.f32 0.6931472, %v2211_v25  ;;  %2214 = vlog2.f32 %v1547_v33 }
 0x682   : > { %v1609_v55 = vadd.f32 %v1589_v63, %v2976_v9 }
 0x683   : > { %v1608_v2 = vadd.f32 %v1587_v59, %v2980_v31 }
 0x684   : > { %1625 = vst [vmem:[%s3016_s9 + $0x58] sm:$0xff] %v1609_v55 }
 0x685   : > { %1624 = vst [vmem:[%s3016_s9 + $0x50] sm:$0xff] %v1608_v2 }
 0x687   : > { %v1948_v51 = vpop.f32.mrb[32].mxu1 }
 0x688   : > { %2216 = vlog2.f32 %v1948_v51  ;;  %v1557_v1 = vpop.f32.mrb[33].mxu1 }
 0x689   : > { %2218 = vlog2.f32 %v1557_v1 }
 0x68a   : > { %v2213_v29 = vpop.eup %2212 }
 0x68b   : > { %v2215_v27 = vpop.eup %2214  ;;  %v1593_v6 = vmul.f32 0.6931472, %v2213_v29 }
 0x68c   : > { %v1591_v38 = vmul.f32 0.6931472, %v2215_v27 }
 0x68d   : > { %v1611_v39 = vadd.f32 %v1593_v6, %v2993_v0 }
 0x68e   : > { %v1610_v3 = vadd.f32 %v1591_v38, %v2987_v19 }
 0x68f   : > { %1627 = vst [vmem:[%s3016_s9 + $0x68] sm:$0xff] %v1611_v39 }
 0x690   : > { %1626 = vst [vmem:[%s3016_s9 + $0x60] sm:$0xff] %v1610_v3 }
 0x692   : > { %v2217_v9 = vpop.eup %2216 }
 0x693   : > { %v2219_v31 = vpop.eup %2218  ;;  %v1597_v15 = vmul.f32 0.6931472, %v2217_v9 }
 0x694   : > { %v1595_v35 = vmul.f32 0.6931472, %v2219_v31 }
 0x695   : > { %v1613_v30 = vadd.f32 %v1597_v15, %v3003_v4 }
 0x696   : > { %v1612_v41 = vadd.f32 %v1595_v35, %v2998_v28 }
 0x697   : > { %1629 = vst [vmem:[%s3016_s9 + $0x78] sm:$0xff] %v1613_v30 }
 0x698   : > { %1628 = vst [vmem:[%s3016_s9 + $0x70] sm:$0xff] %v1612_v41 }
 0x699 PF: > { %s15_s18 = sadd.s32 1, %s2226_s18  }
 0x69a   : > { %p12_p4 = scmp.ge.s32.totalorder %s15_s18, 4  }
 0x69c   :  { %14 = sbr.rel (!%p12_p4) target bundleno = 1 (0x1), region = 70 }

</bundles_post_ra>
